<compile_context>
chip_gen: v5e
topology: v5e:2x2
jax: 0.10.0
libtpu: 0.0.40
codegen_flags: <defaults>
</compile_context>

<pallas_src>
import functools

import jax
import jax.numpy as jnp
from jax import lax
from jax.experimental import pallas as pl
from jax.experimental.pallas import tpu as pltpu


def _self_attention_kernel(k_ref, fboxt_ref, out_ref, att_ref):
    # k_ref     : (BT, nc, wh)    raw 1x1 kernels (channels on sublane, keys on lanes)
    # fboxt_ref : (BT, HpWp, nc)  3x3-box-summed, zero-padded feature map (transposed)
    # out_ref   : (BT, nc, HpWp)  conv_transpose result over the *padded* grid
    #                             (interior crop happens in the wrapper)
    # att_ref   : (BT, HpWp, wh)  attention scores (softmax over the wh keys, lane-dense)
    b_tile = k_ref.shape[0]
    for b in range(b_tile):  # static unroll (b_tile is a small compile-time constant)
        # --- kernel normalization: (k + 1e-7) / ||k + 1e-7||_2 over channels ---
        k = k_ref[b] + 1e-07                                           # (nc, wh)
        inv_norm = lax.rsqrt(jnp.sum(k * k, axis=0, keepdims=True))    # (1, wh)  EUP
        kn = k * inv_norm                                              # (nc, wh)

        # --- 1x1 conv on the (pre-box-summed) padded map:
        #     prop[p, j] = sum_c fbox[c, p] * kn[c, j] ---
        prop = jnp.dot(fboxt_ref[b], kn,
                       preferred_element_type=jnp.float32)             # (HpWp, wh)

        # --- softmax over the wh "key" channels (lane axis) ---
        m = jnp.max(prop, axis=1, keepdims=True)
        e = jnp.exp(prop - m)
        denom = jnp.sum(e, axis=1, keepdims=True)
        a = e * pl.reciprocal(denom)                                   # (HpWp, wh)
        att_ref[b] = a                                                 # lane-dense store

        # --- conv_transpose 1x1 over the padded grid (A @ B^T pattern):
        #     out[c, p] = sum_j kn[c, j] * a[p, j] ---
        out_ref[b] = lax.dot_general(kn, a, (((1,), (1,)), ((), ())),
                                     preferred_element_type=jnp.float32)  # (nc, HpWp)


def _pick_batch_tile(bz, nc, hpwp, wh, budget_bytes=6 * 1024 * 1024):
    # Per-batch VMEM footprint of the blocks (with sublane/lane padding), x2 for
    # double buffering; cap the batch tile so everything stays well inside VMEM.
    sub = lambda n: ((n + 7) // 8) * 8
    lane = lambda n: ((n + 127) // 128) * 128
    per_batch = 4 * 2 * (
        sub(hpwp) * lane(wh)       # attention output block
        + sub(hpwp) * lane(nc)     # transposed box-summed map
        + sub(nc) * lane(hpwp)     # feature output block
        + sub(nc) * lane(wh)       # kernels
    )
    cap = max(1, min(bz, 4, budget_bytes // max(per_batch, 1)))
    if bz >= 2:
        # Keep at least 2 grid steps so the "parallel" batch axis can use both v7x cores.
        cap = min(cap, max(1, bz // 2))
    for t in range(int(cap), 0, -1):
        if bz % t == 0:
            return t
    return 1


@functools.partial(jax.jit, static_argnames=("patch_size", "propagate_size"))
def self_attention_forward(foreground, patch_size=3, propagate_size=3):
    """Pallas implementation of SelfAttention.forward.

    foreground: (bz, nc, w, h) float32 (NCHW, like the PyTorch module)
    returns: (output, att_score)
      output    : (bz, nc, w, h)
      att_score : (bz*w*h, (w+2*pad)*(h+2*pad))
    """
    foreground = foreground.astype(jnp.float32)
    bz, nc, w, h = foreground.shape
    pad = patch_size // 2
    Hp, Wp = w + 2 * pad, h + 2 * pad
    wh, HpWp = w * h, Hp * Wp

    # 1x1 conv kernels, channels-on-sublane (this is just the NCHW memory order).
    K = foreground.reshape(bz, nc, wh)                                    # (bz, nc, wh)

    # Zero-padded feature map, i.e. what conv2d(padding=pad) sees.
    fpad = jnp.pad(foreground, ((0, 0), (0, 0), (pad, pad), (pad, pad)))  # (bz,nc,Hp,Wp)

    # avg_pool2d(3,1,padding=1)*9 == per-channel 3x3 zero-padded box sum; it is linear
    # and commutes with the 1x1-conv channel contraction, so apply it to the nc-wide
    # padded map here (O(nc*HpWp) adds) instead of the (HpWp,wh) conv result in-kernel.
    if propagate_size != 1:
        # TODO(synk): PyTorch hard-codes a 3x3 pool whenever propagate_size != 1.
        fpp = jnp.pad(fpad, ((0, 0), (0, 0), (1, 1), (1, 1)))
        fbox = jnp.zeros_like(fpad)
        for dy in range(3):
            for dx in range(3):
                fbox = fbox + fpp[:, :, dy:dy + Hp, dx:dx + Wp]
    else:
        fbox = fpad
    FboxT = fbox.reshape(bz, nc, HpWp).transpose(0, 2, 1)                 # (bz, HpWp, nc)

    b_tile = _pick_batch_tile(bz, nc, HpWp, wh)
    grid = (bz // b_tile,)

    grid_spec = pltpu.PrefetchScalarGridSpec(
        num_scalar_prefetch=0,
        grid=grid,
        in_specs=[
            pl.BlockSpec((b_tile, nc, wh), lambda b: (b, 0, 0)),      # K
            pl.BlockSpec((b_tile, HpWp, nc), lambda b: (b, 0, 0)),    # box-summed map^T
        ],
        out_specs=[
            pl.BlockSpec((b_tile, nc, HpWp), lambda b: (b, 0, 0)),    # padded output
            pl.BlockSpec((b_tile, HpWp, wh), lambda b: (b, 0, 0)),    # attention
        ],
    )

    out_full, att = pl.pallas_call(
        _self_attention_kernel,
        out_shape=(
            jax.ShapeDtypeStruct((bz, nc, HpWp), jnp.float32),
            jax.ShapeDtypeStruct((bz, HpWp, wh), jnp.float32),
        ),
        grid_spec=grid_spec,
        compiler_params=pltpu.CompilerParams(
            dimension_semantics=("parallel",),
        ),
    )(K, FboxT)

    # conv_transpose2d(..., padding=pad) with 1x1 kernels == crop the padded grid.
    output = out_full.reshape(bz, nc, Hp, Wp)[:, :, pad:pad + w, pad:pad + h]

    # att[b] is (HpWp, wh), i.e. the contiguous layout of attention_scores.permute(0,2,3,1).
    # TODO(synk): PyTorch's .view on that non-contiguous permute would error; we keep the
    # contiguous-flat reinterpretation: reshape the flat buffer to (wh, HpWp) per batch.
    att_score = att.reshape(bz * wh, HpWp)

    return output, att_score


def _reference(foreground, patch_size=3, propagate_size=3):
    """Pure-JAX reference (direct, un-hoisted formulation) for a numerical self-check."""
    foreground = foreground.astype(jnp.float32)
    bz, nc, w, h = foreground.shape
    pad = patch_size // 2
    Hp, Wp = w + 2 * pad, h + 2 * pad
    wh, HpWp = w * h, Hp * Wp

    k = foreground.reshape(bz, nc, wh) + 1e-07
    kn = k / jnp.sqrt(jnp.sum(k * k, axis=1, keepdims=True))              # (bz, nc, wh)
    fpad = jnp.pad(foreground, ((0, 0), (0, 0), (pad, pad), (pad, pad)))  # (bz,nc,Hp,Wp)
    conv = jnp.einsum('bcyx,bcj->bjyx', fpad, kn,
                      precision=lax.Precision.HIGHEST)                    # (bz,wh,Hp,Wp)
    if propagate_size != 1:
        conv = lax.reduce_window(conv, 0.0, lax.add, (1, 1, 3, 3), (1, 1, 1, 1),
                                 ((0, 0), (0, 0), (1, 1), (1, 1)))
    att = jax.nn.softmax(conv, axis=1)
    out_full = jnp.einsum('bjyx,bcj->bcyx', att, kn,
                          precision=lax.Precision.HIGHEST)
    output = out_full[:, :, pad:pad + w, pad:pad + h]
    att_score = att.transpose(0, 2, 3, 1).reshape(bz * wh, HpWp)
    return output, att_score


if __name__ == "__main__":
    key = jax.random.PRNGKey(0)
    bz, nc, w, h = 2, 4, 16, 16
    foreground = jax.random.normal(key, (bz, nc, w, h), dtype=jnp.float32)

    output, att_score = self_attention_forward(foreground)
    jax.block_until_ready((output, att_score))

    assert output.shape == (bz, nc, w, h)
    assert att_score.shape == (bz * w * h, (w + 2) * (h + 2))

    # Lightweight numerical self-check against the pure-JAX reference.
    ref_out, ref_att = _reference(foreground)
    err_out = float(jnp.max(jnp.abs(output - ref_out)))
    err_att = float(jnp.max(jnp.abs(att_score - ref_att)))
    assert err_out < 1e-3 and err_att < 1e-3, (err_out, err_att)

    print("KERNEL_OK")
</pallas_src>

<mosaic_0001>
module attributes {stable_mosaic.version = 11 : i64} {
  func.func @_self_attention_kernel(%arg0: i32, %arg1: memref<1x4x256xf32, #tpu.memory_space<vmem>>, %arg2: memref<1x324x4xf32, #tpu.memory_space<vmem>>, %arg3: memref<1x4x324xf32, #tpu.memory_space<vmem>>, %arg4: memref<1x324x256xf32, #tpu.memory_space<vmem>>) attributes {dimension_semantics = [#tpu.dimension_semantics<parallel>], iteration_bounds = array<i64: 2>, scalar_prefetch = 0 : i64, scratch_operands = 0 : i64, tpu.core_type = #tpu.core_type<tc>, window_params = [{transform_indices = @transform_0, window_bounds = array<i64: 1, 4, 256>}, {transform_indices = @transform_1, window_bounds = array<i64: 1, 324, 4>}, {transform_indices = @transform_2, window_bounds = array<i64: 1, 4, 324>}, {transform_indices = @transform_3, window_bounds = array<i64: 1, 324, 256>}]} {
    %c0 = arith.constant 0 : index
    %c0_0 = arith.constant 0 : index
    %c0_1 = arith.constant 0 : index
    %0 = vector.load %arg1[%c0, %c0_0, %c0_1] : memref<1x4x256xf32, #tpu.memory_space<vmem>>, vector<1x4x256xf32>
    %1 = vector.shape_cast %0 : vector<1x4x256xf32> to vector<4x256xf32>
    %cst = arith.constant 1.000000e-07 : f32
    %2 = vector.broadcast %cst : f32 to vector<4x256xf32>
    %3 = arith.addf %1, %2 : vector<4x256xf32>
    %4 = arith.mulf %3, %3 : vector<4x256xf32>
    %cst_2 = arith.constant dense<0.000000e+00> : vector<256xf32>
    %5 = vector.multi_reduction <add>, %4, %cst_2 [0] : vector<4x256xf32> to vector<256xf32>
    %6 = vector.shape_cast %5 : vector<256xf32> to vector<1x256xf32>
    %7 = math.rsqrt %6 : vector<1x256xf32>
    %8 = vector.broadcast %7 : vector<1x256xf32> to vector<4x256xf32>
    %9 = arith.mulf %3, %8 : vector<4x256xf32>
    %c0_3 = arith.constant 0 : index
    %c0_4 = arith.constant 0 : index
    %c0_5 = arith.constant 0 : index
    %10 = vector.load %arg2[%c0_3, %c0_4, %c0_5] : memref<1x324x4xf32, #tpu.memory_space<vmem>>, vector<1x324x4xf32>
    %11 = vector.shape_cast %10 : vector<1x324x4xf32> to vector<324x4xf32>
    %cst_6 = arith.constant dense<0.000000e+00> : vector<324x256xf32>
    %12 = tpu.matmul %11, %9, %cst_6 {dimension_numbers = #tpu.dot_dimension_numbers<[1], [0], [0], [1], [0, 0, 1, 1], [], []>} : vector<324x4xf32>, vector<4x256xf32>, vector<324x256xf32> -> vector<324x256xf32>
    %cst_7 = arith.constant dense<0xFF800000> : vector<324xf32>
    %13 = vector.multi_reduction <maximumf>, %12, %cst_7 [1] : vector<324x256xf32> to vector<324xf32>
    %14 = vector.shape_cast %13 : vector<324xf32> to vector<324x1xf32>
    %15 = vector.broadcast %14 : vector<324x1xf32> to vector<324x256xf32>
    %16 = arith.subf %12, %15 : vector<324x256xf32>
    %17 = math.exp %16 : vector<324x256xf32>
    %cst_8 = arith.constant dense<0.000000e+00> : vector<324xf32>
    %18 = vector.multi_reduction <add>, %17, %cst_8 [1] : vector<324x256xf32> to vector<324xf32>
    %19 = vector.shape_cast %18 : vector<324xf32> to vector<324x1xf32>
    %20 = tpu.reciprocal %19 : vector<324x1xf32> -> vector<324x1xf32>
    %21 = vector.broadcast %20 : vector<324x1xf32> to vector<324x256xf32>
    %22 = arith.mulf %17, %21 : vector<324x256xf32>
    %c0_9 = arith.constant 0 : index
    %c0_10 = arith.constant 0 : index
    %c0_11 = arith.constant 0 : index
    %23 = vector.load %arg4[%c0_9, %c0_10, %c0_11] : memref<1x324x256xf32, #tpu.memory_space<vmem>>, vector<1x324x256xf32>
    %24 = vector.shape_cast %23 : vector<1x324x256xf32> to vector<324x256xf32>
    %25 = vector.shape_cast %22 : vector<324x256xf32> to vector<1x324x256xf32>
    tpu.vector_store %arg4[%c0_9, %c0_10, %c0_11], %25 {strides = array<i32>} : memref<1x324x256xf32, #tpu.memory_space<vmem>>, vector<1x324x256xf32>,
    %cst_12 = arith.constant dense<0.000000e+00> : vector<4x324xf32>
    %26 = tpu.matmul %9, %22, %cst_12 {dimension_numbers = #tpu.dot_dimension_numbers<[1], [1], [0], [0], [0, 0, 1, 0], [], []>} : vector<4x256xf32>, vector<324x256xf32>, vector<4x324xf32> -> vector<4x324xf32>
    %c0_13 = arith.constant 0 : index
    %c0_14 = arith.constant 0 : index
    %c0_15 = arith.constant 0 : index
    %27 = vector.load %arg3[%c0_13, %c0_14, %c0_15] : memref<1x4x324xf32, #tpu.memory_space<vmem>>, vector<1x4x324xf32>
    %28 = vector.shape_cast %27 : vector<1x4x324xf32> to vector<4x324xf32>
    %29 = vector.shape_cast %26 : vector<4x324xf32> to vector<1x4x324xf32>
    tpu.vector_store %arg3[%c0_13, %c0_14, %c0_15], %29 {strides = array<i32>} : memref<1x4x324xf32, #tpu.memory_space<vmem>>, vector<1x4x324xf32>,
    return
  }
  func.func @transform_0(%arg0: i32) -> (i32, i32, i32) {
    %c0_i32 = arith.constant 0 : i32
    %c0_i32_0 = arith.constant 0 : i32
    %c0_i32_1 = arith.constant 0 : i32
    return %arg0, %c0_i32, %c0_i32_0 : i32, i32, i32
  }
  func.func @transform_1(%arg0: i32) -> (i32, i32, i32) {
    %c0_i32 = arith.constant 0 : i32
    %c0_i32_0 = arith.constant 0 : i32
    %c0_i32_1 = arith.constant 0 : i32
    return %arg0, %c0_i32, %c0_i32_0 : i32, i32, i32
  }
  func.func @transform_2(%arg0: i32) -> (i32, i32, i32) {
    %c0_i32 = arith.constant 0 : i32
    %c0_i32_0 = arith.constant 0 : i32
    %c0_i32_1 = arith.constant 0 : i32
    return %arg0, %c0_i32, %c0_i32_0 : i32, i32, i32
  }
  func.func @transform_3(%arg0: i32) -> (i32, i32, i32) {
    %c0_i32 = arith.constant 0 : i32
    %c0_i32_0 = arith.constant 0 : i32
    %c0_i32_1 = arith.constant 0 : i32
    return %arg0, %c0_i32, %c0_i32_0 : i32, i32, i32
  }
}

</mosaic_0001>

<bundles_post_ra>
// kernel: self_attention_forward.1
= control target key start
LH: loop header
LB: loop body
LE: loop exit
PB: predicated region body
PF: predicated region fallthrough
CT: control target
= control target key end

     0   :  { %s2566_s12 = smov 0   ;;  %s4547_s0 = inlined_call_operand.vmem [shape: f32[2,4,256], index: 0, kind: input, shape index: {}]   ;;  %s4548_s1 = inlined_call_operand.vmem [shape: f32[2,324,4], index: 1, kind: input, shape index: {}]   ;;  %s4549_s2 = inlined_call_operand.vmem [shape: f32[2,4,324], index: 2, kind: output, shape index: {0}]   ;;  %s4550_s3 = inlined_call_operand.vmem [shape: f32[2,324,256], index: 3, kind: output, shape index: {1}]  }
   0x1 LB: > { %s2174_s13 = sadd.s32 4294967295, %s2544_s12   ;;  %p2178_p0 = scmp.ge.s32.totalorder %s2544_s12, 1  ;;  %s2544_s12 = sphi %s2566_s12, %s14_s12  }
   0x2   : > { %p150_p1 = scmp.lt.s32.totalorder %s2544_s12, 3 }
   0x4   : > { %p151_p2 = pnand %p2178_p0, %p150_p1 }
   0x6   : > { %154 = sbr.rel (%p151_p2) target bundleno = 987 (0x3db), region = 28 }
   0xb   : > { %p184_p3 = scmp.lt.s32.totalorder %s2174_s13, 1  ;;  %vm213_vm0 = vcmask 1043456   ;;  %vm299_vm7 = vcmask 31744  }
   0xd   : > { %s4906_s13 = smov (!%p184_p3, %s2174_s13), 1 }
   0xe   : > { %s2270_s14 = sshll.u32 %s4906_s13, 3  ;;  %s2273_s18 = smul.u32 328, %s4906_s13 }
   0xf   : > { %s188_s17 = scalar_lea.vmem %s4547_s0, %s2270_s14  ;;  %s2275_s22 = smul.u32 656, %s4906_s13 }
  0x10   : > { %v204_v0 = vld [vmem:[%s188_s17] sm:$0xff]  ;;  %s2587_s21 = scalar_lea.vmem %s4548_s1, %s2273_s18  ;;  %s2274_s26 = smul.u32 12, %s4906_s13 }
  0x11   : > { %v205_v1 = vadd.f32 1e-07, %v204_v0  ;;  %v254_v36 = vld [vmem:[%s2587_s21] sm:$0xff]  ;;  %v284_v40 = vld [vmem:[%s2587_s21 + $0xf0] sm:$0xff]  ;;  %v255_v41 = vld [vmem:[%s2587_s21 + $0x8] sm:$0xff]  ;;  %s3221_s25 = scalar_lea.vmem %s4550_s3, %s2275_s22 }
  0x12   : > { %v2591_v37 = vld [vmem:[%s2587_s21 + $0xe0] sm:$0xff]  ;;  %v2605_v42 = vld [vmem:[%s2587_s21 + $0xe8] sm:$0xff]  ;;  %v285_v43 = vld [vmem:[%s2587_s21 + $0xf8] sm:$0xff]  ;;  %s198_s29 = scalar_lea.vmem %s4549_s2, %s2274_s26 }
  0x13   : > { %v206_v2 = vmul.f32 %v205_v1, %v205_v1  ;;  %v256_v44 = vld [vmem:[%s2587_s21 + $0x10] sm:$0xff]  ;;  %v286_v45 = vld [vmem:[%s2587_s21 + $0x100] sm:$0xff]  ;;  %v257_v46 = vld [vmem:[%s2587_s21 + $0x18] sm:$0xff] }
  0x14   : > { %v287_v47 = vld [vmem:[%s2587_s21 + $0x108] sm:$0xff]  ;;  %v258_v48 = vld [vmem:[%s2587_s21 + $0x20] sm:$0xff]  ;;  %v288_v49 = vld [vmem:[%s2587_s21 + $0x110] sm:$0xff] }
  0x15   : > { %208 = vst [vmem:[#allocation1] ss:$2 sm:$0xff] %v206_v2  ;;  %v259_v50 = vld [vmem:[%s2587_s21 + $0x28] sm:$0xff]  ;;  %v289_v51 = vld [vmem:[%s2587_s21 + $0x118] sm:$0xff]  ;;  %v260_v52 = vld [vmem:[%s2587_s21 + $0x30] sm:$0xff] }
  0x16   : > { %v290_v53 = vld [vmem:[%s2587_s21 + $0x120] sm:$0xff]  ;;  %v261_v54 = vld [vmem:[%s2587_s21 + $0x38] sm:$0xff]  ;;  %v291_v55 = vld [vmem:[%s2587_s21 + $0x128] sm:$0xff] }
  0x17   : > { %v262_v56 = vld [vmem:[%s2587_s21 + $0x40] sm:$0xff]  ;;  %v292_v57 = vld [vmem:[%s2587_s21 + $0x130] sm:$0xff]  ;;  %v263_v58 = vld [vmem:[%s2587_s21 + $0x48] sm:$0xff] }
  0x18   : > { %v293_v59 = vld [vmem:[%s2587_s21 + $0x138] sm:$0xff]  ;;  %v264_v60 = vld [vmem:[%s2587_s21 + $0x50] sm:$0xff]  ;;  %v294_v61 = vld [vmem:[%s2587_s21 + $0x140] sm:$0xf] }
  0x19   : > { %v265_v62 = vld [vmem:[%s2587_s21 + $0x58] sm:$0xff]  ;;  %v266_v63 = vld [vmem:[%s2587_s21 + $0x60] sm:$0xff]  ;;  %v267_v0 = vld [vmem:[%s2587_s21 + $0x68] sm:$0xff] }
  0x1a   : > { %v269_v2 = vld [vmem:[%s2587_s21 + $0x78] sm:$0xff] }
  0x1c   : > { %v209_v3 = vld.sshfl [vmem:[#allocation1] sm:$0xff pattern:$0x75316420]  ;;  %v210_v4 = vld.sshfl [vmem:[#allocation1 + $0x8] sm:$0xff pattern:$0x75316420] }
  0x1d   : > { %v214_v5 = vsel %vm213_vm0, %v209_v3, 0.0  ;;  %v221_v6 = vsel %vm213_vm0, %v210_v4, 0.0  ;;  %v270_v4 = vld [vmem:[%s2587_s21 + $0x80] sm:$0xff] }
  0x1e   : > { %v215_v7 = vrot.slane %v214_v5, 4  ;;  %v222_v8 = vrot.slane %v221_v6, 4 }
  0x20   : > { %v216_v9 = vadd.f32 %v215_v7, %v214_v5  ;;  %v223_v10 = vadd.f32 %v222_v8, %v221_v6 }
  0x22   : > { %v217_v11 = vrot.slane %v216_v9, 2  ;;  %v224_v12 = vrot.slane %v223_v10, 2 }
  0x24   : > { %v218_v13 = vadd.f32 %v217_v11, %v216_v9  ;;  %v225_v14 = vadd.f32 %v224_v12, %v223_v10  ;;  %v271_v9 = vld [vmem:[%s2587_s21 + $0x88] sm:$0xff] }
  0x26   : > { %v219_v15 = vrot.slane %v218_v13, 1  ;;  %v226_v16 = vrot.slane %v225_v14, 1 }
  0x28   : > { %v220_v17 = vadd.f32 %v219_v15, %v218_v13  ;;  %v227_v18 = vadd.f32 %v226_v16, %v225_v14  ;;  %v272_v15 = vld [vmem:[%s2587_s21 + $0x90] sm:$0xff] }
  0x2a   : > { %2284 = vrsqrt.f32 %v220_v17  ;;  %vm234_vm1 = vweird.f32 %v220_v17  ;;  %vm244_vm3 = vweird.f32 %v227_v18 }
  0x2b   : > { %2286 = vrsqrt.f32 %v227_v18 }
  0x30   : > { %v2285_v19 = vpop.eup %2284 }
  0x31   : > { %v2287_v20 = vpop.eup %2286  ;;  %v229_v21 = vmul.f32 %v2285_v19, %v220_v17  ;;  %vm235_vm2 = vweird.f32 %v2285_v19 }
  0x32   : > { %v239_v22 = vmul.f32 %v2287_v20, %v227_v18  ;;  %vm245_vm4 = vweird.f32 %v2287_v20  ;;  %vm236_vm5 = vmor %vm234_vm1, %vm235_vm2 }
  0x33   : > { %v230_v23 = vmul.f32 %v2285_v19, %v229_v21  ;;  %vm246_vm6 = vmor %vm244_vm3, %vm245_vm4  ;;  %v273_v21 = vld [vmem:[%s2587_s21 + $0x98] sm:$0xff] }
  0x34   : > { %v240_v24 = vmul.f32 %v2287_v20, %v239_v22 }
  0x35   : > { %v231_v25 = vmul.f32 0.5, %v230_v23 }
  0x36   : > { %v241_v26 = vmul.f32 0.5, %v240_v24 }
  0x37   : > { %v232_v27 = vsub.f32 1.5, %v231_v25 }
  0x38   : > { %v242_v28 = vsub.f32 1.5, %v241_v26 }
  0x39   : > { %v233_v29 = vmul.f32 %v2285_v19, %v232_v27 }
  0x3a   : > { %v243_v30 = vmul.f32 %v2287_v20, %v242_v28  ;;  %v274_v28 = vld [vmem:[%s2587_s21 + $0xa0] sm:$0xff] }
  0x3b   : > { %v237_v31 = vsel %vm236_vm5, %v2285_v19, %v233_v29 }
  0x3c   : > { %v247_v32 = vsel %vm246_vm6, %v2287_v20, %v243_v30 }
  0x3d   : > { %v250_v33 = vrot.slane %v247_v32, 4 }
  0x3f   : > { %v251_v34 = vsel %vm213_vm0, %v237_v31, %v250_v33 }
  0x40   : > { %v253_v35 = vmul.f32 %v251_v34, %v205_v1  ;;  %v268_v1 = vld [vmem:[%s2587_s21 + $0x70] sm:$0xff] }
  0x42   : > { %296 = vst [vmem:[#allocation1] ss:$2 sm:$0xff] %v253_v35 }
  0x49   : > { %v297_v38 = vld.sshfl [vmem:[#allocation1] sm:$0xff pattern:$0x75316420]  ;;  %v298_v39 = vld.sshfl [vmem:[#allocation1 + $0x8] sm:$0xff pattern:$0x75316420] }
  0x4a   : > { %2184 = vmatpush.msk.msra.mxu0 %vm213_vm0, %v297_v38  ;;  %2226 = vmatpush.msk.msra.mxu1 %vm213_vm0, %v298_v39  ;;  %1941 = vst [vmem:[#allocation1] ss:$2 sm:$0xff] %v253_v35  ;;  %v275_v35 = vld [vmem:[%s2587_s21 + $0xa8] sm:$0xff] }
  0x4b   : > { %2272 = vmatpush.msk.msra.mxu3 %vm213_vm0, %v298_v39  ;;  %2185 = vmatmul.msk.f32.vlgmr.msra.gmra.mxu0 %vm299_vm7, %v254_v36 }
  0x4c   : > { %2227 = vmatmul.msk.f32.vlgmr.msra.gmra.mxu1 %vm299_vm7, %v254_v36  ;;  %2255 = vmatmul.msk.f32.vlgmr.msra.gmra.mxu3 %vm299_vm7, %v2591_v37 }
  0x4d   : > { %2271 = vmatpush.msk.msra.mxu2 %vm213_vm0, %v297_v38 }
  0x4e   : > { %2215 = vmatmul.msk.f32.vlgmr.msra.gmra.mxu2 %vm299_vm7, %v284_v40 }
  0x53   : > { %2186 = vmatmul.msk.f32.gmra.mxu0 %vm299_vm7, %v255_v41 }
  0x54   : > { %2228 = vmatmul.msk.f32.gmra.mxu1 %vm299_vm7, %v255_v41  ;;  %2256 = vmatmul.msk.f32.gmra.mxu3 %vm299_vm7, %v2605_v42 }
  0x56   : > { %2216 = vmatmul.msk.f32.gmra.mxu2 %vm299_vm7, %v285_v43 }
  0x5b   : > { %2187 = vmatmul.msk.f32.gmra.mxu0 %vm299_vm7, %v256_v44 }
  0x5c   : > { %2229 = vmatmul.msk.f32.gmra.mxu1 %vm299_vm7, %v256_v44  ;;  %2257 = vmatmul.msk.f32.gmra.mxu3 %vm299_vm7, %v284_v40 }
  0x5e   : > { %2217 = vmatmul.msk.f32.gmra.mxu2 %vm299_vm7, %v286_v45 }
  0x63   : > { %2188 = vmatmul.msk.f32.gmra.mxu0 %vm299_vm7, %v257_v46 }
  0x64   : > { %2230 = vmatmul.msk.f32.gmra.mxu1 %vm299_vm7, %v257_v46  ;;  %2258 = vmatmul.msk.f32.gmra.mxu3 %vm299_vm7, %v285_v43  ;;  %v276_v43 = vld [vmem:[%s2587_s21 + $0xb0] sm:$0xff] }
  0x66   : > { %2218 = vmatmul.msk.f32.gmra.mxu2 %vm299_vm7, %v287_v47 }
  0x6b   : > { %2189 = vmatmul.msk.f32.gmra.mxu0 %vm299_vm7, %v258_v48 }
  0x6c   : > { %2231 = vmatmul.msk.f32.gmra.mxu1 %vm299_vm7, %v258_v48  ;;  %2259 = vmatmul.msk.f32.gmra.mxu3 %vm299_vm7, %v286_v45 }
  0x6e   : > { %2219 = vmatmul.msk.f32.gmra.mxu2 %vm299_vm7, %v288_v49 }
  0x73   : > { %2190 = vmatmul.msk.f32.gmra.mxu0 %vm299_vm7, %v259_v50 }
  0x74   : > { %2232 = vmatmul.msk.f32.gmra.mxu1 %vm299_vm7, %v259_v50  ;;  %2260 = vmatmul.msk.f32.gmra.mxu3 %vm299_vm7, %v287_v47 }
  0x76   : > { %2220 = vmatmul.msk.f32.gmra.mxu2 %vm299_vm7, %v289_v51 }
  0x7b   : > { %2191 = vmatmul.msk.f32.gmra.mxu0 %vm299_vm7, %v260_v52 }
  0x7c   : > { %2233 = vmatmul.msk.f32.gmra.mxu1 %vm299_vm7, %v260_v52  ;;  %2261 = vmatmul.msk.f32.gmra.mxu3 %vm299_vm7, %v288_v49  ;;  %v277_v49 = vld [vmem:[%s2587_s21 + $0xb8] sm:$0xff] }
  0x7e   : > { %2221 = vmatmul.msk.f32.gmra.mxu2 %vm299_vm7, %v290_v53 }
  0x83   : > { %2192 = vmatmul.msk.f32.gmra.mxu0 %vm299_vm7, %v261_v54 }
  0x84   : > { %2234 = vmatmul.msk.f32.gmra.mxu1 %vm299_vm7, %v261_v54  ;;  %2262 = vmatmul.msk.f32.gmra.mxu3 %vm299_vm7, %v289_v51 }
  0x86   : > { %2222 = vmatmul.msk.f32.gmra.mxu2 %vm299_vm7, %v291_v55 }
  0x8b   : > { %2193 = vmatmul.msk.f32.gmra.mxu0 %vm299_vm7, %v262_v56 }
  0x8c   : > { %2235 = vmatmul.msk.f32.gmra.mxu1 %vm299_vm7, %v262_v56  ;;  %2263 = vmatmul.msk.f32.gmra.mxu3 %vm299_vm7, %v290_v53 }
  0x8e   : > { %2223 = vmatmul.msk.f32.gmra.mxu2 %vm299_vm7, %v292_v57 }
  0x93   : > { %2194 = vmatmul.msk.f32.gmra.mxu0 %vm299_vm7, %v263_v58 }
  0x94   : > { %2236 = vmatmul.msk.f32.gmra.mxu1 %vm299_vm7, %v263_v58  ;;  %2264 = vmatmul.msk.f32.gmra.mxu3 %vm299_vm7, %v291_v55  ;;  %v278_v55 = vld [vmem:[%s2587_s21 + $0xc0] sm:$0xff] }
  0x96   : > { %2224 = vmatmul.msk.f32.gmra.mxu2 %vm299_vm7, %v293_v59 }
  0x9b   : > { %2195 = vmatmul.msk.f32.gmra.mxu0 %vm299_vm7, %v264_v60 }
  0x9c   : > { %2237 = vmatmul.msk.f32.gmra.mxu1 %vm299_vm7, %v264_v60  ;;  %2265 = vmatmul.msk.f32.gmra.mxu3 %vm299_vm7, %v292_v57 }
  0x9e   : > { %2225 = vmatmul.msk.f32.gmra.mxu2 %vm299_vm7, %v294_v61 }
  0xa3   : > { %2196 = vmatmul.msk.f32.gmra.mxu0 %vm299_vm7, %v265_v62 }
  0xa4   : > { %2238 = vmatmul.msk.f32.gmra.mxu1 %vm299_vm7, %v265_v62  ;;  %2266 = vmatmul.msk.f32.gmra.mxu3 %vm299_vm7, %v293_v59 }
  0xab   : > { %2197 = vmatmul.msk.f32.gmra.mxu0 %vm299_vm7, %v266_v63 }
  0xac   : > { %2239 = vmatmul.msk.f32.gmra.mxu1 %vm299_vm7, %v266_v63  ;;  %2267 = vmatmul.msk.f32.gmra.mxu3 %vm299_vm7, %v294_v61  ;;  %v279_v61 = vld [vmem:[%s2587_s21 + $0xc8] sm:$0xff] }
  0xb3   : > { %2198 = vmatmul.msk.f32.gmra.mxu0 %vm299_vm7, %v267_v0 }
  0xb4   : > { %2240 = vmatmul.msk.f32.gmra.mxu1 %vm299_vm7, %v267_v0 }
  0xbb   : > { %2199 = vmatmul.msk.f32.gmra.mxu0 %vm299_vm7, %v268_v1 }
  0xbc   : > { %2241 = vmatmul.msk.f32.gmra.mxu1 %vm299_vm7, %v268_v1 }
  0xc3   : > { %2200 = vmatmul.msk.f32.gmra.mxu0 %vm299_vm7, %v269_v2 }
  0xc4   : > { %2242 = vmatmul.msk.f32.gmra.mxu1 %vm299_vm7, %v269_v2 }
  0xc8   : > { %v2684_v3 = vpop.f32.mrf.mxu0 }
  0xc9   : > { %4650 = vst [vmem:[#allocation2_spill] sm:$0xff] %v2684_v3  ;;  %v2687_v5 = vpop.f32.mrf.mxu1 }
  0xca   : > { %4651 = vst [vmem:[#allocation3_spill] sm:$0xff] %v2687_v5  ;;  %v707_v6 = vmax.f32 %v2684_v3, %v2687_v5 }
  0xcb   : > { %2201 = vmatmul.msk.f32.gmra.mxu0 %vm299_vm7, %v270_v4 }
  0xcc   : > { %2243 = vmatmul.msk.f32.gmra.mxu1 %vm299_vm7, %v270_v4  ;;  %708 = vmax.xlane.f32.xlu1 %v707_v6  ;;  %v280_v6 = vld [vmem:[%s2587_s21 + $0xd0] sm:$0xff] }
  0xcf   : > { %v2693_v7 = vpop.f32.mrf.mxu3 }
  0xd0   : > { %v2695_v8 = vpop.f32.mrf.mxu0 }
  0xd1   : > { %4652 = vst [vmem:[#allocation4_spill] sm:$0xff] %v2695_v8  ;;  %v2698_v10 = vpop.f32.mrf.mxu1  ;;  %v2700_v11 = vpop.f32.mrf.mxu2 }
  0xd2   : > { %4653 = vst [vmem:[#allocation5_spill] sm:$0xff] %v2698_v10  ;;  %v710_v12 = vmax.f32 %v2695_v8, %v2698_v10 }
  0xd3   : > { %2202 = vmatmul.msk.f32.gmra.mxu0 %vm299_vm7, %v271_v9 }
  0xd4   : > { %2244 = vmatmul.msk.f32.gmra.mxu1 %vm299_vm7, %v271_v9  ;;  %711 = vmax.xlane.f32.xlu1 %v710_v12 }
  0xd7   : > { %v2706_v13 = vpop.f32.mrf.mxu3 }
  0xd8   : > { %v2708_v14 = vpop.f32.mrf.mxu0 }
  0xd9   : > { %4654 = vst [vmem:[#allocation6_spill] sm:$0xff] %v2708_v14  ;;  %v2711_v16 = vpop.f32.mrf.mxu1  ;;  %v2713_v17 = vpop.f32.mrf.mxu2 }
  0xda   : > { %4655 = vst [vmem:[#allocation7_spill] sm:$0xff] %v2711_v16  ;;  %v713_v18 = vmax.f32 %v2708_v14, %v2711_v16 }
  0xdb   : > { %2203 = vmatmul.msk.f32.gmra.mxu0 %vm299_vm7, %v272_v15 }
  0xdc   : > { %2245 = vmatmul.msk.f32.gmra.mxu1 %vm299_vm7, %v272_v15  ;;  %714 = vmax.xlane.f32.xlu1 %v713_v18 }
  0xdf   : > { %v2719_v19 = vpop.f32.mrf.mxu3 }
  0xe0   : > { %v2721_v20 = vpop.f32.mrf.mxu0  ;;  %v797_v24 = vmax.f32 %v2700_v11, %v2719_v19 }
  0xe1   : > { %v2724_v22 = vpop.f32.mrf.mxu1  ;;  %v2726_v23 = vpop.f32.mrf.mxu2 }
  0xe2   : > { %4656 = vst [vmem:[#allocation8_spill] sm:$0xff] %v2726_v23  ;;  %v716_v25 = vmax.f32 %v2721_v20, %v2724_v22 }
  0xe3   : > { %2204 = vmatmul.msk.f32.gmra.mxu0 %vm299_vm7, %v273_v21 }
  0xe4   : > { %2246 = vmatmul.msk.f32.gmra.mxu1 %vm299_vm7, %v273_v21  ;;  %798 = vmax.xlane.f32.xlu1 %v797_v24  ;;  %v281_v21 = vld [vmem:[%s2587_s21 + $0xd8] sm:$0xff] }
  0xe5   : > { %717 = vmax.xlane.f32.xlu2 %v716_v25 }
  0xe7   : > { %v2734_v26 = vpop.f32.mrf.mxu3 }
  0xe8   : > { %v2736_v27 = vpop.f32.mrf.mxu0  ;;  %v800_v32 = vmax.f32 %v2713_v17, %v2734_v26 }
  0xe9   : > { %v2739_v29 = vpop.f32.mrf.mxu1  ;;  %v2741_v30 = vpop.f32.mrf.mxu2 }
  0xea   : > { %v719_v31 = vmax.f32 %v2736_v27, %v2739_v29 }
  0xeb   : > { %2205 = vmatmul.msk.f32.gmra.mxu0 %vm299_vm7, %v274_v28 }
  0xec   : > { %2247 = vmatmul.msk.f32.gmra.mxu1 %vm299_vm7, %v274_v28  ;;  %720 = vmax.xlane.f32.xlu0 %v719_v31 }
  0xed   : > { %801 = vmax.xlane.f32.xlu2 %v800_v32 }
  0xef   : > { %v2749_v33 = vpop.f32.mrf.mxu3 }
  0xf0   : > { %4657 = vst [vmem:[#allocation9_spill] sm:$0xff] %v2749_v33  ;;  %v2751_v34 = vpop.f32.mrf.mxu0 }
  0xf1   : > { %v2754_v36 = vpop.f32.mrf.mxu1  ;;  %v2756_v38 = vpop.f32.mrf.mxu2 }
  0xf2   : > { %v722_v39 = vmax.f32 %v2751_v34, %v2754_v36 }
  0xf3   : > { %2206 = vmatmul.msk.f32.gmra.mxu0 %vm299_vm7, %v275_v35 }
  0xf4   : > { %2248 = vmatmul.msk.f32.gmra.mxu1 %vm299_vm7, %v275_v35  ;;  %723 = vmax.xlane.f32.xlu1 %v722_v39 }
  0xf7   : > { %v2762_v40 = vpop.f32.mrf.mxu3 }
  0xf8   : > { %v2764_v41 = vpop.f32.mrf.mxu0 }
  0xf9   : > { %v2767_v44 = vpop.f32.mrf.mxu1  ;;  %v2769_v45 = vpop.f32.mrf.mxu2 }
  0xfa   : > { %v725_v46 = vmax.f32 %v2764_v41, %v2767_v44 }
  0xfb   : > { %2207 = vmatmul.msk.f32.gmra.mxu0 %vm299_vm7, %v276_v43 }
  0xfc   : > { %2249 = vmatmul.msk.f32.gmra.mxu1 %vm299_vm7, %v276_v43  ;;  %726 = vmax.xlane.f32.xlu2 %v725_v46 }
  0xff   : > { %v2775_v47 = vpop.f32.mrf.mxu3 }
 0x100   : > { %v2777_v48 = vpop.f32.mrf.mxu0 }
 0x101   : > { %v2780_v50 = vpop.f32.mrf.mxu1  ;;  %v2785_v52 = vpop.f32.mrf.mxu2 }
 0x102   : > { %v728_v51 = vmax.f32 %v2777_v48, %v2780_v50  ;;  %4658 = vst [vmem:[#allocation10_spill] sm:$0xff] %v2785_v52 }
 0x103   : > { %2208 = vmatmul.msk.f32.gmra.mxu0 %vm299_vm7, %v277_v49 }
 0x104   : > { %2250 = vmatmul.msk.f32.gmra.mxu1 %vm299_vm7, %v277_v49  ;;  %729 = vmax.xlane.f32.xlu0 %v728_v51 }
 0x107   : > { %v2788_v53 = vpop.f32.mrf.mxu3 }
 0x108   : > { %v2790_v54 = vpop.f32.mrf.mxu0 }
 0x109   : > { %v2793_v56 = vpop.f32.mrf.mxu1  ;;  %v2799_v58 = vpop.f32.mrf.mxu2 }
 0x10a   : > { %v731_v57 = vmax.f32 %v2790_v54, %v2793_v56  ;;  %4659 = vst [vmem:[#allocation11_spill] sm:$0xff] %v2799_v58 }
 0x10b   : > { %2209 = vmatmul.msk.f32.gmra.mxu0 %vm299_vm7, %v278_v55 }
 0x10c   : > { %2251 = vmatmul.msk.f32.gmra.mxu1 %vm299_vm7, %v278_v55  ;;  %732 = vmax.xlane.f32.xlu1 %v731_v57 }
 0x10f   : > { %v2801_v59 = vpop.f32.mrf.mxu3 }
 0x110   : > { %4660 = vst [vmem:[#allocation12_spill] sm:$0xff] %v2801_v59  ;;  %v2803_v60 = vpop.f32.mrf.mxu0 }
 0x111   : > { %v2806_v62 = vpop.f32.mrf.mxu1  ;;  %v2814_v1 = vpop.f32.mrf.mxu2 }
 0x112   : > { %v734_v63 = vmax.f32 %v2803_v60, %v2806_v62  ;;  %4662 = vst [vmem:[#allocation14_spill] sm:$0xff] %v2814_v1 }
 0x113   : > { %2210 = vmatmul.msk.f32.gmra.mxu0 %vm299_vm7, %v279_v61 }
 0x114   : > { %2252 = vmatmul.msk.f32.gmra.mxu1 %vm299_vm7, %v279_v61  ;;  %735 = vmax.xlane.f32.xlu0 %v734_v63 }
 0x117   : > { %v2812_v0 = vpop.f32.mrf.mxu3 }
 0x118   : > { %4661 = vst [vmem:[#allocation13_spill] sm:$0xff] %v2812_v0  ;;  %v2816_v2 = vpop.f32.mrf.mxu0  ;;  %v818_v4 = vmax.f32 %v2799_v58, %v2812_v0 }
 0x119   : > { %v2821_v9 = vpop.f32.mrf.mxu1  ;;  %v2834_v25 = vpop.f32.mrf.mxu2 }
 0x11a   : > { %819 = vmax.xlane.f32.xlu2 %v818_v4  ;;  %v737_v12 = vmax.f32 %v2816_v2, %v2821_v9  ;;  %4664 = vst [vmem:[#allocation16_spill] sm:$0xff] %v2834_v25 }
 0x11b   : > { %2211 = vmatmul.msk.f32.gmra.mxu0 %vm299_vm7, %v280_v6 }
 0x11c   : > { %2253 = vmatmul.msk.f32.gmra.mxu1 %vm299_vm7, %v280_v6 }
 0x11f   : > { %v2827_v15 = vpop.f32.mrf.mxu3 }
 0x120   : > { %4663 = vst [vmem:[#allocation15_spill] sm:$0xff] %v2827_v15  ;;  %v2829_v18 = vpop.f32.mrf.mxu0  ;;  %v821_v28 = vmax.f32 %v2814_v1, %v2827_v15 }
 0x121   : > { %v2832_v24 = vpop.f32.mrf.mxu1  ;;  %v2850_v43 = vpop.f32.mrf.mxu2 }
 0x122   : > { %738 = vmax.xlane.f32.xlu2 %v737_v12  ;;  %4666 = vst [vmem:[#allocation18_spill] sm:$0xff] %v2850_v43  ;;  %v827_v46 = vsel %vm213_vm0, %v2850_v43, -inf  ;;  %v740_v57 = vmax.f32 %v2829_v18, %v2832_v24 }
 0x123   : > { %2212 = vmatmul.msk.f32.gmra.mxu0 %vm299_vm7, %v281_v21 }
 0x124   : > { %2254 = vmatmul.msk.f32.gmra.mxu1 %vm299_vm7, %v281_v21 }
 0x127   : > { %v2840_v31 = vpop.f32.mrf.mxu3 }
 0x128   : > { %4665 = vst [vmem:[#allocation17_spill] sm:$0xff] %v2840_v31  ;;  %v2842_v32 = vpop.f32.mrf.mxu0 }
 0x129   : > { %v2844_v35 = vpop.f32.mrf.mxu1 }
 0x12a   : > { %822 = vmax.xlane.f32.xlu2 %v821_v28  ;;  %v743_v39 = vmax.f32 %v2842_v32, %v2844_v35 }
 0x12b   : > { %2213 = vmatmul.msk.f32.gmra.mxu0 %vm299_vm7, %v2591_v37  ;;  %v824_v37 = vmax.f32 %v2834_v25, %v2840_v31 }
 0x12c   : > { %744 = vmax.xlane.f32.xlu1 %v743_v39 }
 0x12f   : > { %v2854_v49 = vpop.f32.mrf.mxu3 }
 0x130   : > { %4667 = vst [vmem:[#allocation19_spill] sm:$0xff] %v2854_v49  ;;  %v828_v51 = vsel %vm213_vm0, %v2854_v49, -inf  ;;  %v2858_v55 = vpop.f32.mrf.mxu0 }
 0x131   : > { %v2862_v61 = vpop.f32.mrf.mxu1  ;;  %v829_v63 = vmax.f32 %v827_v46, %v828_v51 }
 0x132   : > { %741 = vmax.xlane.f32.xlu2 %v740_v57  ;;  %v746_v6 = vmax.f32 %v2858_v55, %v2862_v61 }
 0x133   : > { %2214 = vmatmul.msk.f32.gmra.mxu0 %vm299_vm7, %v2605_v42 }
 0x134   : > { %830 = vmax.xlane.f32.xlu1 %v829_v63 }
 0x138   : > { %v2868_v4 = vpop.f32.mrf.mxu0 }
 0x139   : > { %v2872_v12 = vpop.f32.mrf.mxu1 }
 0x13a   : > { %825 = vmax.xlane.f32.xlu2 %v824_v37  ;;  %v749_v21 = vmax.f32 %v2868_v4, %v2872_v12 }
 0x13c   : > { %747 = vmax.xlane.f32.xlu1 %v746_v6  ;;  %750 = vmax.xlane.f32.xlu0 %v749_v21 }
 0x140   : > { %v2876_v28 = vpop.f32.mrf.mxu0 }
 0x141   : > { %v2878_v42 = vpop.f32.mrf.mxu1 }
 0x142   : > { %v752_v39 = vmax.f32 %v2876_v28, %v2878_v42 }
 0x144   : > { %753 = vmax.xlane.f32.xlu0 %v752_v39 }
 0x148   : > { %v2882_v46 = vpop.f32.mrf.mxu0 }
 0x149   : > { %4668 = vst [vmem:[#allocation20_spill] sm:$0xff] %v2882_v46  ;;  %v2884_v51 = vpop.f32.mrf.mxu1 }
 0x14a   : > { %4669 = vst [vmem:[#allocation21_spill] sm:$0xff] %v2884_v51 }
 0x150   : > { %v2886_v57 = vpop.f32.mrf.mxu0 }
 0x151   : > { %v2888_v63 = vpop.f32.mrf.mxu1 }
 0x158   : > { %v2890_v37 = vpop.f32.mrf.mxu0 }
 0x159   : > { %4670 = vst [vmem:[#allocation22_spill] sm:$0xff] %v2890_v37  ;;  %v2892_v6 = vpop.f32.mrf.mxu1 }
 0x15a   : > { %4671 = vst [vmem:[#allocation23_spill] sm:$0xff] %v2892_v6  ;;  %v761_v21 = vmax.f32 %v2890_v37, %v2892_v6  ;;  %v2914_v37 = vpop.xlane.xlu2 %717 }
 0x15c   : > { %762 = vmax.xlane.f32.xlu1 %v761_v21 }
 0x160   : > { %v2896_v31 = vpop.f32.mrf.mxu0 }
 0x161   : > { %4672 = vst [vmem:[#allocation24_spill] sm:$0xff] %v2896_v31  ;;  %v2898_v25 = vpop.f32.mrf.mxu1 }
 0x162   : > { %4673 = vst [vmem:[#allocation25_spill] sm:$0xff] %v2898_v25  ;;  %v764_v39 = vmax.f32 %v2896_v31, %v2898_v25  ;;  %v2916_v25 = vpop.xlane.xlu1 %708 }
 0x164   : > { %765 = vmax.xlane.f32.xlu1 %v764_v39  ;;  %v2918_v39 = vpop.xlane.xlu0 %720 }
 0x168   : > { %v2902_v16 = vpop.f32.mrf.mxu0 }
 0x169   : > { %4674 = vst [vmem:[#allocation26_spill] sm:$0xff] %v2902_v16  ;;  %v2904_v49 = vpop.f32.mrf.mxu1 }
 0x16a   : > { %4675 = vst [vmem:[#allocation27_spill] sm:$0xff] %v2904_v49  ;;  %v767_v43 = vmax.f32 %v2902_v16, %v2904_v49  ;;  %v802_v49 = vpop.xlane.xlu2 %801 }
 0x16c   : > { %768 = vmax.xlane.f32.xlu1 %v767_v43 }
 0x170   : > { %v2908_v15 = vpop.f32.mrf.mxu0 }
 0x171   : > { %4676 = vst [vmem:[#allocation28_spill] sm:$0xff] %v2908_v15  ;;  %v2910_v6 = vpop.f32.mrf.mxu1 }
 0x172   : > { %4677 = vst [vmem:[#allocation29_spill] sm:$0xff] %v2910_v6  ;;  %v770_v21 = vmax.f32 %v2908_v15, %v2910_v6  ;;  %v2928_v6 = vpop.xlane.xlu1 %711  ;;  %v2934_v58 = vpop.xlane.xlu2 %726 }
 0x173   : > { %4681 = vst [vmem:[#allocation33_spill] sm:$0xff] %v2928_v6 }
 0x174   : > { %771 = vmax.xlane.f32.xlu1 %v770_v21 }
 0x177   : > { %v730_v16 = vpop.xlane.xlu0 %729 }
 0x178   : > { %v2920_v31 = vpop.f32.mrf.mxu0 }
 0x179   : > { %4678 = vst [vmem:[#allocation30_spill] sm:$0xff] %v2920_v31  ;;  %v2922_v1 = vpop.f32.mrf.mxu1 }
 0x17a   : > { %4679 = vst [vmem:[#allocation31_spill] sm:$0xff] %v2922_v1  ;;  %v773_v43 = vmax.f32 %v2920_v31, %v2922_v1  ;;  %v2944_v3 = vpop.xlane.xlu1 %714 }
 0x17b   : > { %4685 = vst [vmem:[#allocation37_spill] sm:$0xff] %v2944_v3 }
 0x17c   : > { %774 = vmax.xlane.f32.xlu2 %v773_v43 }
 0x180   : > { %v2926_v0 = vpop.f32.mrf.mxu0 }
 0x181   : > { %4680 = vst [vmem:[#allocation32_spill] sm:$0xff] %v2926_v0  ;;  %v2930_v15 = vpop.f32.mrf.mxu1 }
 0x182   : > { %4682 = vst [vmem:[#allocation34_spill] sm:$0xff] %v2930_v15  ;;  %v776_v21 = vmax.f32 %v2926_v0, %v2930_v15 }
 0x184   : > { %777 = vmax.xlane.f32.xlu2 %v776_v21 }
 0x187   : > { %v736_v14 = vpop.xlane.xlu0 %735 }
 0x188   : > { %v850_v10 = vsub.f32 %v2803_v60, %v736_v14  ;;  %v851_v1 = vsub.f32 %v2806_v62, %v736_v14  ;;  %v2938_v43 = vpop.f32.mrf.mxu0 }
 0x189   : > { %4683 = vst [vmem:[#allocation35_spill] sm:$0xff] %v2938_v43  ;;  %v2940_v31 = vpop.f32.mrf.mxu1 }
 0x18a   : > { %4684 = vst [vmem:[#allocation36_spill] sm:$0xff] %v2940_v31  ;;  %v950_v8 = vmul.f32 1.442695, %v850_v10  ;;  %v952_v5 = vmul.f32 1.442695, %v851_v1  ;;  %v779_v6 = vmax.f32 %v2938_v43, %v2940_v31  ;;  %v894_v43 = vsub.f32 %v2713_v17, %v802_v49 }
 0x18c   : > { %2288 = vpow2.f32 %v950_v8  ;;  %780 = vmax.xlane.f32.xlu2 %v779_v6  ;;  %v2960_v8 = vpop.xlane.xlu1 %798 }
 0x18d   : > { %2290 = vpow2.f32 %v952_v5  ;;  %v2946_v21 = vpop.xlane.xlu2 %819 }
 0x18e   : > { %4686 = vst [vmem:[#allocation38_spill] sm:$0xff] %v2946_v21 }
 0x190   : > { %v2948_v15 = vpop.f32.mrf.mxu0 }
 0x191   : > { %4687 = vst [vmem:[#allocation39_spill] sm:$0xff] %v2948_v15  ;;  %v2950_v60 = vpop.f32.mrf.mxu1 }
 0x192   : > { %4688 = vst [vmem:[#allocation40_spill] sm:$0xff] %v2950_v60  ;;  %v2952_v14 = vpop.eup %2288  ;;  %v782_v10 = vmax.f32 %v2948_v15, %v2950_v60  ;;  %v895_v60 = vsub.f32 %v2734_v26, %v802_v49 }
 0x193   : > { %4689 = vst [vmem:[#allocation41_spill] sm:$0xff] %v2952_v14  ;;  %v2956_v62 = vpop.eup %2290 }
 0x194   : > { %4690 = vst [vmem:[#allocation42_spill] sm:$0xff] %v2956_v62  ;;  %783 = vmax.xlane.f32.xlu2 %v782_v10  ;;  %v1105_v1 = vadd.f32 %v2956_v62, %v2952_v14  ;;  %v1038_v14 = vmul.f32 1.442695, %v894_v43  ;;  %v2972_v15 = vpop.xlane.xlu1 %723 }
 0x195   : > { %v739_v5 = vpop.xlane.xlu2 %738 }
 0x196   : > { %v852_v6 = vsub.f32 %v2816_v2, %v739_v5  ;;  %v853_v31 = vsub.f32 %v2821_v9, %v739_v5  ;;  %1106 = vadd.xlane.f32.xlu0 %v1105_v1  ;;  %v1040_v2 = vmul.f32 1.442695, %v895_v60 }
 0x198   : > { %v954_v0 = vmul.f32 1.442695, %v852_v6  ;;  %v956_v21 = vmul.f32 1.442695, %v853_v31  ;;  %v2965_v3 = vpop.f32.mrf.mxu0  ;;  %v846_v31 = vsub.f32 %v2777_v48, %v730_v16 }
 0x199   : > { %v2968_v10 = vpop.f32.mrf.mxu1 }
 0x19a   : > { %2292 = vpow2.f32 %v954_v0  ;;  %v785_v62 = vmax.f32 %v2965_v3, %v2968_v10  ;;  %v847_v0 = vsub.f32 %v2780_v50, %v730_v16  ;;  %v942_v60 = vmul.f32 1.442695, %v846_v31 }
 0x19b   : > { %2294 = vpow2.f32 %v956_v21 }
 0x19c   : > { %2296 = vpow2.f32 %v1038_v14  ;;  %v944_v14 = vmul.f32 1.442695, %v847_v0  ;;  %v733_v1 = vpop.xlane.xlu1 %732 }
 0x19d   : > { %v2974_v9 = vpop.xlane.xlu2 %822  ;;  %2298 = vpow2.f32 %v1040_v2  ;;  %v848_v50 = vsub.f32 %v2790_v54, %v733_v1  ;;  %v849_v0 = vsub.f32 %v2793_v56, %v733_v1  ;;  %v893_v1 = vsub.f32 %v2719_v19, %v2960_v8 }
 0x19e   : > { %786 = vmax.xlane.f32.xlu0 %v785_v62  ;;  %2300 = vpow2.f32 %v942_v60 }
 0x19f   : > { %2302 = vpow2.f32 %v944_v14  ;;  %v948_v60 = vmul.f32 1.442695, %v849_v0  ;;  %v892_v14 = vsub.f32 %v2700_v11, %v2960_v8  ;;  %v844_v8 = vsub.f32 %v2764_v41, %v2934_v58 }
 0x1a0   : > { %v2976_v17 = vpop.eup %2292  ;;  %v2979_v26 = vpop.f32.mrf.mxu0  ;;  %v845_v0 = vsub.f32 %v2767_v44, %v2934_v58  ;;  %v809_v41 = vmax.f32 %v2756_v38, %v2775_v47 }
 0x1a1   : > { %v2981_v49 = vpop.eup %2294  ;;  %v2984_v21 = vpop.f32.mrf.mxu1  ;;  %v1034_v11 = vmul.f32 1.442695, %v892_v14  ;;  %v938_v14 = vmul.f32 1.442695, %v844_v8 }
 0x1a2   : > { %4691 = vst [vmem:[#allocation43_spill] sm:$0xff] %v2981_v49  ;;  %v788_v43 = vmax.f32 %v2979_v26, %v2984_v21  ;;  %v1108_v62 = vadd.f32 %v2981_v49, %v2976_v17  ;;  %v2990_v5 = vpop.eup %2296 }
 0x1a3   : > { %4692 = vst [vmem:[#allocation44_spill] sm:$0xff] %v2984_v21  ;;  %v2994_v16 = vpop.eup %2298 }
 0x1a4   : > { %789 = vmax.xlane.f32.xlu1 %v788_v43  ;;  %v3004_v54 = vpop.eup %2300 }
 0x1a5   : > { %v742_v48 = vpop.xlane.xlu2 %741 }
 0x1a6   : > { %v854_v6 = vsub.f32 %v2829_v18, %v742_v48  ;;  %v855_v2 = vsub.f32 %v2832_v24, %v742_v48  ;;  %1109 = vadd.xlane.f32.xlu0 %v1108_v62  ;;  %v1171_v18 = vadd.f32 %v2994_v16, %v2990_v5  ;;  %v946_v24 = vmul.f32 1.442695, %v848_v50  ;;  %v3006_v62 = vpop.eup %2302 }
 0x1a7   : > { %v1099_v50 = vadd.f32 %v3006_v62, %v3004_v54 }
 0x1a8   : > { %v958_v31 = vmul.f32 1.442695, %v854_v6  ;;  %v960_v43 = vmul.f32 1.442695, %v855_v2  ;;  %v2997_v21 = vpop.f32.mrf.mxu0  ;;  %v815_v6 = vmax.f32 %v2785_v52, %v2801_v59  ;;  %v4710_v59 = vld [vmem:[#allocation5_spill] sm:$0xff] }
 0x1a9   : > { %v791_v49 = vmax.f32 %v2997_v21, %v2693_v7  ;;  %v4711_v52 = vld [vmem:[#allocation37_spill] sm:$0xff] }
 0x1aa   : > { %2304 = vpow2.f32 %v958_v31  ;;  %v1036_v31 = vmul.f32 1.442695, %v893_v1 }
 0x1ab   : > { %2306 = vpow2.f32 %v960_v43  ;;  %792 = vmax.xlane.f32.xlu2 %v791_v49  ;;  %v745_v49 = vpop.xlane.xlu1 %744 }
 0x1ac   : > { %1172 = vadd.xlane.f32.xlu1 %v1171_v18  ;;  %2308 = vpow2.f32 %v946_v24  ;;  %v856_v18 = vsub.f32 %v2842_v32, %v745_v49  ;;  %v857_v24 = vsub.f32 %v2844_v35, %v745_v49  ;;  %v838_v49 = vsub.f32 %v2721_v20, %v2914_v37 }
 0x1ad   : > { %2310 = vpow2.f32 %v948_v60  ;;  %v758_v60 = vmax.f32 %v2886_v57, %v2888_v63  ;;  %v812_v20 = vmax.f32 %v2769_v45, %v2788_v53 }
 0x1ae   : > { %2312 = vpow2.f32 %v1034_v11  ;;  %v962_v44 = vmul.f32 1.442695, %v856_v18  ;;  %v964_v32 = vmul.f32 1.442695, %v857_v24  ;;  %v843_v11 = vsub.f32 %v2754_v36, %v2972_v15 }
 0x1af   : > { %2314 = vpow2.f32 %v1036_v31  ;;  %v839_v31 = vsub.f32 %v2724_v22, %v2914_v37  ;;  %v806_v18 = vmax.f32 %v2741_v30, %v2762_v40 }
 0x1b0   : > { %v3010_v56 = vpop.eup %2304  ;;  %2316 = vpow2.f32 %v938_v14  ;;  %v936_v36 = vmul.f32 1.442695, %v843_v11  ;;  %v840_v14 = vsub.f32 %v2736_v27, %v2918_v39  ;;  %v803_v27 = vmax.f32 %v2726_v23, %v2749_v33 }
 0x1b1   : > { %v3014_v48 = vpop.eup %2306  ;;  %v928_v22 = vmul.f32 1.442695, %v839_v31  ;;  %v751_v31 = vpop.xlane.xlu0 %750 }
 0x1b2   : > { %v1111_v2 = vadd.f32 %v3014_v48, %v3010_v56  ;;  %v3022_v19 = vpop.eup %2308 }
 0x1b3   : > { %816 = vmax.xlane.f32.xlu2 %v815_v6  ;;  %v3026_v43 = vpop.eup %2310  ;;  %v940_v6 = vmul.f32 1.442695, %v845_v0  ;;  %v926_v0 = vmul.f32 1.442695, %v838_v49  ;;  %v930_v49 = vmul.f32 1.442695, %v840_v14 }
 0x1b4   : > { %1112 = vadd.xlane.f32.xlu0 %v1111_v2  ;;  %1100 = vadd.xlane.f32.xlu1 %v1099_v50  ;;  %v1102_v1 = vadd.f32 %v3026_v43, %v3022_v19  ;;  %v3038_v2 = vpop.xlane.xlu1 %830  ;;  %v3040_v58 = vpop.eup %2312  ;;  %v842_v50 = vsub.f32 %v2751_v34, %v2972_v15 }
 0x1b5   : > { %v3042_v35 = vpop.eup %2314  ;;  %2318 = vpow2.f32 %v940_v6 }
 0x1b6   : > { %4693 = vst [vmem:[#allocation45_spill] sm:$0xff] %v3042_v35  ;;  %2320 = vpow2.f32 %v962_v44  ;;  %v1168_v8 = vadd.f32 %v3042_v35, %v3040_v58  ;;  %v934_v34 = vmul.f32 1.442695, %v842_v50  ;;  %v3058_v24 = vpop.eup %2316 }
 0x1b7   : > { %2322 = vpow2.f32 %v964_v32 }
 0x1b8   : > { %2324 = vpow2.f32 %v926_v0 }
 0x1b9   : > { %2326 = vpow2.f32 %v934_v34  ;;  %v861_v34 = vsub.f32 %v2872_v12, %v751_v31 }
 0x1ba   : > { %2328 = vpow2.f32 %v936_v36 }
 0x1bb   : > { %759 = vmax.xlane.f32.xlu2 %v758_v60  ;;  %v3060_v15 = vpop.eup %2318  ;;  %2330 = vpow2.f32 %v928_v22 }
 0x1bc   : > { %1103 = vadd.xlane.f32.xlu0 %v1102_v1  ;;  %810 = vmax.xlane.f32.xlu1 %v809_v41  ;;  %v748_v37 = vpop.xlane.xlu1 %747  ;;  %v3062_v60 = vpop.eup %2320  ;;  %v841_v41 = vsub.f32 %v2739_v29, %v2918_v39  ;;  %v1096_v32 = vadd.f32 %v3060_v15, %v3058_v24  ;;  %2332 = vpow2.f32 %v930_v49 }
 0x1bd   : > { %v3066_v1 = vpop.eup %2322  ;;  %v858_v6 = vsub.f32 %v2858_v55, %v748_v37  ;;  %v859_v44 = vsub.f32 %v2862_v61, %v748_v37 }
 0x1be   : > { %v1114_v50 = vadd.f32 %v3066_v1, %v3062_v60  ;;  %v932_v11 = vmul.f32 1.442695, %v841_v41  ;;  %v3078_v29 = vpop.eup %2324 }
 0x1bf   : > { %4694 = vst [vmem:[#allocation46_spill] sm:$0xff] %v3078_v29  ;;  %v966_v39 = vmul.f32 1.442695, %v858_v6  ;;  %v3080_v55 = vpop.eup %2326  ;;  %v968_v61 = vmul.f32 1.442695, %v859_v44  ;;  %v754_v44 = vpop.xlane.xlu0 %753 }
 0x1c0   : > { %2334 = vpow2.f32 %v932_v11  ;;  %v862_v49 = vsub.f32 %v2876_v28, %v754_v44 }
 0x1c1   : > { %2336 = vpow2.f32 %v966_v39 }
 0x1c2   : > { %2338 = vpow2.f32 %v968_v61 }
 0x1c3   : > { %1169 = vadd.xlane.f32.xlu2 %v1168_v8  ;;  %v3082_v8 = vpop.eup %2328 }
 0x1c4   : > { %813 = vmax.xlane.f32.xlu0 %v812_v20  ;;  %807 = vmax.xlane.f32.xlu1 %v806_v18  ;;  %v3084_v0 = vpop.eup %2330  ;;  %v3086_v20 = vpop.f32.mrf.mxu0  ;;  %v860_v18 = vsub.f32 %v2868_v4, %v751_v31  ;;  %v1093_v36 = vadd.f32 %v3082_v8, %v3080_v55  ;;  %v972_v4 = vmul.f32 1.442695, %v861_v34  ;;  %v974_v31 = vmul.f32 1.442695, %v862_v49 }
 0x1c5   : > { %4695 = vst [vmem:[#allocation47_spill] sm:$0xff] %v3084_v0  ;;  %v794_v22 = vmax.f32 %v3086_v20, %v2706_v13  ;;  %v1087_v37 = vadd.f32 %v3084_v0, %v3078_v29  ;;  %v3096_v14 = vpop.eup %2332 }
 0x1c6   : > { %4696 = vst [vmem:[#allocation48_spill] sm:$0xff] %v3096_v14  ;;  %v970_v41 = vmul.f32 1.442695, %v860_v18  ;;  %v3098_v6 = vpop.eup %2334 }
 0x1c7   : > { %4697 = vst [vmem:[#allocation49_spill] sm:$0xff] %v3098_v6  ;;  %v3100_v12 = vpop.eup %2336 }
 0x1c8   : > { %4698 = vst [vmem:[#allocation50_spill] sm:$0xff] %v3100_v12  ;;  %2340 = vpow2.f32 %v970_v41 }
 0x1c9   : > { %2342 = vpow2.f32 %v972_v4  ;;  %v755_v4 = vmax.f32 %v2882_v46, %v2884_v51 }
 0x1ca   : > { %2344 = vpow2.f32 %v974_v31  ;;  %v4707_v31 = vld [vmem:[#allocation3_spill] sm:$0xff] }
 0x1cb   : > { %1097 = vadd.xlane.f32.xlu2 %v1096_v32  ;;  %v3102_v32 = vpop.eup %2338 }
 0x1cc   : > { %1115 = vadd.xlane.f32.xlu0 %v1114_v50  ;;  %804 = vmax.xlane.f32.xlu1 %v803_v27  ;;  %4699 = vst [vmem:[#allocation51_spill] sm:$0xff] %v3102_v32  ;;  %v863_v50 = vsub.f32 %v2878_v42, %v754_v44  ;;  %v1090_v27 = vadd.f32 %v3098_v6, %v3096_v14 }
 0x1cd   : > { %v1117_v11 = vadd.f32 %v3102_v32, %v3100_v12  ;;  %v4717_v12 = vld [vmem:[#allocation40_spill] sm:$0xff] }
 0x1ce   : > { %v976_v39 = vmul.f32 1.442695, %v863_v50  ;;  %v3110_v61 = vpop.eup %2340  ;;  %v4706_v50 = vld [vmem:[#allocation2_spill] sm:$0xff] }
 0x1cf   : > { %4700 = vst [vmem:[#allocation52_spill] sm:$0xff] %v3110_v61  ;;  %v3112_v18 = vpop.eup %2342  ;;  %v3126_v41 = vpop.xlane.xlu1 %762 }
 0x1d0   : > { %4701 = vst [vmem:[#allocation53_spill] sm:$0xff] %v3112_v18  ;;  %2346 = vpow2.f32 %v976_v39  ;;  %v1120_v28 = vadd.f32 %v3112_v18, %v3110_v61  ;;  %v3116_v42 = vpop.eup %2344  ;;  %v833_v39 = vsub.f32 %v4707_v31, %v2916_v25  ;;  %v4713_v18 = vld [vmem:[#allocation38_spill] sm:$0xff]  ;;  %v4714_v61 = vld [vmem:[#allocation11_spill] sm:$0xff] }
 0x1d1   : > { %4702 = vst [vmem:[#allocation54_spill] sm:$0xff] %v3116_v42  ;;  %v906_v6 = vsub.f32 %v4714_v61, %v4713_v18 }
 0x1d3   : > { %1094 = vadd.xlane.f32.xlu2 %v1093_v36  ;;  %v3120_v36 = vpop.xlane.xlu2 %825 }
 0x1d4   : > { %795 = vmax.xlane.f32.xlu0 %v794_v22  ;;  %1088 = vadd.xlane.f32.xlu1 %v1087_v37  ;;  %4704 = vst [vmem:[#allocation56_spill] sm:$0xff] %v3120_v36 }
 0x1d6   : > { %v3118_v34 = vpop.eup %2346 }
 0x1d7   : > { %4703 = vst [vmem:[#allocation55_spill] sm:$0xff] %v3118_v34  ;;  %v1123_v22 = vadd.f32 %v3118_v34, %v3116_v42  ;;  %v3132_v49 = vpop.xlane.xlu1 %765  ;;  %v4712_v34 = vld [vmem:[#allocation6_spill] sm:$0xff] }
 0x1d8   : > { %4705 = vst [vmem:[#allocation57_spill] sm:$0xff] %v3132_v49  ;;  %v836_v42 = vsub.f32 %v4712_v34, %v4711_v52 }
 0x1db   : > { %1091 = vadd.xlane.f32.xlu2 %v1090_v27  ;;  %v832_v27 = vsub.f32 %v4706_v50, %v2916_v25  ;;  %v4715_v25 = vld [vmem:[#allocation13_spill] sm:$0xff] }
 0x1dc   : > { %1118 = vadd.xlane.f32.xlu0 %v1117_v11  ;;  %v907_v31 = vsub.f32 %v4715_v25, %v4713_v18  ;;  %v1062_v18 = vmul.f32 1.442695, %v906_v6 }
 0x1dd   : > { %v914_v23 = vmul.f32 1.442695, %v832_v27  ;;  %v4716_v27 = vld [vmem:[#allocation39_spill] sm:$0xff] }
 0x1df   : > { %v769_v49 = vpop.xlane.xlu1 %768  ;;  %2348 = vpow2.f32 %v914_v23  ;;  %v4719_v23 = vld [vmem:[#allocation15_spill] sm:$0xff] }
 0x1e4   : > { %1121 = vadd.xlane.f32.xlu0 %v1120_v28  ;;  %v4708_v28 = vld [vmem:[#allocation33_spill] sm:$0xff] }
 0x1e5   : > { %v835_v51 = vsub.f32 %v4710_v59, %v4708_v28 }
 0x1e7   : > { %v920_v50 = vmul.f32 1.442695, %v835_v51  ;;  %v909_v51 = vsub.f32 %v4719_v23, %v2974_v9  ;;  %v772_v23 = vpop.xlane.xlu1 %771 }
 0x1ec   : > { %1124 = vadd.xlane.f32.xlu0 %v1123_v22  ;;  %v4709_v22 = vld [vmem:[#allocation4_spill] sm:$0xff] }
 0x1ed   : > { %v834_v33 = vsub.f32 %v4709_v22, %v4708_v28 }
 0x1ef   : > { %v3124_v37 = vpop.xlane.xlu2 %774  ;;  %v918_v46 = vmul.f32 1.442695, %v834_v33  ;;  %v922_v33 = vmul.f32 1.442695, %v836_v42  ;;  %v4722_v42 = vld [vmem:[#allocation19_spill] sm:$0xff] }
 0x1f4   : > { %756 = vmax.xlane.f32.xlu0 %v755_v4  ;;  %v916_v4 = vmul.f32 1.442695, %v833_v39  ;;  %v4718_v39 = vld [vmem:[#allocation14_spill] sm:$0xff] }
 0x1f5   : > { %v908_v34 = vsub.f32 %v4718_v39, %v2974_v9  ;;  %v1068_v9 = vmul.f32 1.442695, %v909_v51 }
 0x1f6   : > { %2350 = vpow2.f32 %v916_v4  ;;  %v4720_v4 = vld [vmem:[#allocation18_spill] sm:$0xff] }
 0x1f7   : > { %v3130_v44 = vpop.xlane.xlu2 %777  ;;  %2352 = vpow2.f32 %v918_v46  ;;  %v912_v25 = vsub.f32 %v4720_v4, %v3038_v2  ;;  %v3161_v46 = vpop.eup %2348 }
 0x1f8   : > { %4721 = vst [vmem:[#allocation2_spill] sm:$0xff] %v3161_v46 }
 0x1f9   : > { %v1074_v6 = vmul.f32 1.442695, %v912_v25 }
 0x1fc   : > { %v3165_v39 = vpop.eup %2350 }
 0x1fd   : > { %4723 = vst [vmem:[#allocation3_spill] sm:$0xff] %v3165_v39 }
 0x1ff   : > { %v3136_v11 = vpop.xlane.xlu2 %780 }
 0x207   : > { %v784_v32 = vpop.xlane.xlu2 %783 }
 0x208   : > { %v882_v22 = vsub.f32 %v4716_v27, %v784_v32  ;;  %v883_v59 = vsub.f32 %v4717_v12, %v784_v32  ;;  %v1064_v12 = vmul.f32 1.442695, %v907_v31  ;;  %v1066_v32 = vmul.f32 1.442695, %v908_v34 }
 0x209   : > { %v3154_v28 = vpop.xlane.xlu0 %1106  ;;  %v913_v27 = vsub.f32 %v4722_v42, %v3038_v2 }
 0x20a   : > { %v1014_v61 = vmul.f32 1.442695, %v882_v22  ;;  %v1016_v14 = vmul.f32 1.442695, %v883_v59  ;;  %2354 = vrcp.f32 %v3154_v28  ;;  %v3167_v22 = vpop.eup %2352  ;;  %vm1334_vm9 = vweird.f32 %v3154_v28 }
 0x20b   : > { %2356 = vpow2.f32 %v920_v50  ;;  %4724 = vst [vmem:[#allocation33_spill] sm:$0xff] %v3167_v22  ;;  %v4725_v50 = vld [vmem:[#allocation26_spill] sm:$0xff]  ;;  %v1076_v34 = vmul.f32 1.442695, %v913_v27 }
 0x20c   : > { %2358 = vpow2.f32 %v1014_v61  ;;  %v872_v59 = vsub.f32 %v4725_v50, %v769_v49 }
 0x20d   : > { %2360 = vpow2.f32 %v1016_v14 }
 0x20e   : > { %2362 = vpow2.f32 %v922_v33  ;;  %v4728_v33 = vld [vmem:[#allocation27_spill] sm:$0xff] }
 0x20f   : > { %2364 = vpow2.f32 %v1062_v18  ;;  %v873_v51 = vsub.f32 %v4728_v33, %v769_v49  ;;  %v4734_v33 = vld [vmem:[#allocation29_spill] sm:$0xff] }
 0x210   : > { %v2355_v31 = vpop.eup %2354  ;;  %2366 = vpow2.f32 %v1064_v12  ;;  %v994_v12 = vmul.f32 1.442695, %v872_v59 }
 0x211   : > { %v3170_v61 = vpop.eup %2356  ;;  %2368 = vpow2.f32 %v1066_v32  ;;  %v1330_v2 = vmul.f32 %v2355_v31, %v3154_v28  ;;  %v787_v14 = vpop.xlane.xlu0 %786  ;;  %v4730_v32 = vld [vmem:[#allocation28_spill] sm:$0xff]  ;;  %vm1335_vm8 = vweird.f32 %v2355_v31  ;;  %v996_v59 = vmul.f32 1.442695, %v873_v51 }
 0x212   : > { %4726 = vst [vmem:[#allocation4_spill] sm:$0xff] %v3170_v61  ;;  %v3173_v4 = vpop.eup %2358  ;;  %2370 = vpow2.f32 %v1068_v9  ;;  %v884_v18 = vsub.f32 %v2965_v3, %v787_v14  ;;  %v885_v25 = vsub.f32 %v2968_v10, %v787_v14  ;;  %v874_v27 = vsub.f32 %v4730_v32, %v772_v23  ;;  %vm3201_vm10 = vmor %vm1334_vm9, %vm1335_vm8 }
 0x213   : > { %4727 = vst [vmem:[#allocation5_spill] sm:$0xff] %v3173_v4  ;;  %v3178_v42 = vpop.eup %2360  ;;  %2372 = vpow2.f32 %v1074_v6  ;;  %v1331_v50 = vsub.f32 1.0, %v1330_v2  ;;  %v1340_v10 = vand.u32 2147483648, %v3154_v28  ;;  %v1338_v2 = vand.u32 2147483647, %v3154_v28  ;;  %v4741_v28 = vld [vmem:[#allocation34_spill] sm:$0xff] }
 0x214   : > { %4729 = vst [vmem:[#allocation37_spill] sm:$0xff] %v3178_v42  ;;  %v3180_v36 = vpop.eup %2362  ;;  %v1018_v35 = vmul.f32 1.442695, %v884_v18  ;;  %v1020_v0 = vmul.f32 1.442695, %v885_v25  ;;  %v1153_v9 = vadd.f32 %v3178_v42, %v3173_v4  ;;  %2374 = vpow2.f32 %v1076_v34 }
 0x215   : > { %v3185_v49 = vpop.eup %2364  ;;  %v1332_v3 = vmul.f32 %v2355_v31, %v1331_v50  ;;  %v875_v18 = vsub.f32 %v4734_v33, %v772_v23  ;;  %v998_v50 = vmul.f32 1.442695, %v874_v27  ;;  %vm1339_vm11 = vcmp.eq.f32.partialorder %v1338_v2, 8.507059e+37  ;;  %v4745_v2 = vld [vmem:[#allocation41_spill] sm:$0xff] }
 0x216   : > { %4731 = vst [vmem:[#allocation6_spill] sm:$0xff] %v3185_v49  ;;  %v3188_v6 = vpop.eup %2366  ;;  %2376 = vpow2.f32 %v1018_v35  ;;  %1154 = vadd.xlane.f32.xlu1 %v1153_v9  ;;  %v4736_v35 = vld [vmem:[#allocation44_spill] sm:$0xff] }
 0x217   : > { %4732 = vst [vmem:[#allocation38_spill] sm:$0xff] %v3188_v6  ;;  %v3191_v14 = vpop.eup %2368  ;;  %2378 = vpow2.f32 %v1020_v0  ;;  %v790_v25 = vpop.xlane.xlu1 %789  ;;  %v1333_v32 = vadd.f32 %v2355_v31, %v1332_v3  ;;  %v4740_v0 = vld [vmem:[#allocation32_spill] sm:$0xff]  ;;  %v879_v3 = vsub.f32 %v4741_v28, %v3130_v44 }
 0x218   : > { %4733 = vst [vmem:[#allocation11_spill] sm:$0xff] %v3191_v14  ;;  %v3196_v34 = vpop.eup %2370  ;;  %2380 = vpow2.f32 %v994_v12  ;;  %v886_v51 = vsub.f32 %v2979_v26, %v790_v25  ;;  %v887_v9 = vsub.f32 %v4736_v35, %v790_v25  ;;  %v878_v23 = vsub.f32 %v4740_v0, %v3130_v44 }
 0x219   : > { %4735 = vst [vmem:[#allocation13_spill] sm:$0xff] %v3196_v34  ;;  %v3205_v4 = vpop.eup %2372  ;;  %v3211_v33 = vpop.xlane.xlu0 %1109  ;;  %v1337_v26 = vsel %vm3201_vm10, %v2355_v31, %v1333_v32  ;;  %v1341_v12 = vor.u32 1.1754944e-38, %v1340_v10  ;;  %v1000_v44 = vmul.f32 1.442695, %v875_v18  ;;  %v1078_v0 = vadd.f32 %v3165_v39, %v3161_v46  ;;  %v4744_v10 = vld [vmem:[#allocation7_spill] sm:$0xff] }
 0x21a   : > { %4739 = vst [vmem:[#allocation39_spill] sm:$0xff] %v3205_v4  ;;  %v1022_v27 = vmul.f32 1.442695, %v886_v51  ;;  %v1024_v25 = vmul.f32 1.442695, %v887_v9  ;;  %2382 = vrcp.f32 %v3211_v33  ;;  %v3216_v35 = vpop.eup %2374  ;;  %v837_v32 = vsub.f32 %v4744_v10, %v4711_v52  ;;  %v4747_v9 = vld [vmem:[#allocation42_spill] sm:$0xff] }
 0x21b   : > { %4742 = vst [vmem:[#allocation40_spill] sm:$0xff] %v3216_v35  ;;  %2384 = vpow2.f32 %v996_v59  ;;  %v1342_v42 = vsel %vm1339_vm11, %v1341_v12, %v1337_v26  ;;  %v1006_v59 = vmul.f32 1.442695, %v878_v23  ;;  %v4751_v26 = vld [vmem:[#allocation22_spill] sm:$0xff]  ;;  %v1008_v39 = vmul.f32 1.442695, %v879_v3 }
 0x21c   : > { %v3225_v31 = vpop.eup %2376  ;;  %2386 = vpow2.f32 %v1022_v27  ;;  %v3230_v51 = vmul.f32 %v4745_v2, %v1342_v42  ;;  %v3233_v28 = vmul.f32 %v4747_v9, %v1342_v42  ;;  %v868_v12 = vsub.f32 %v4751_v26, %v3126_v41  ;;  %v4752_v42 = vld [vmem:[#allocation23_spill] sm:$0xff] }
 0x21d   : > { %4743 = vst [vmem:[#allocation14_spill] sm:$0xff] %v3225_v31  ;;  %v3235_v29 = vpop.eup %2378  ;;  %2388 = vpow2.f32 %v1024_v25  ;;  %v869_v10 = vsub.f32 %v4752_v42, %v3126_v41  ;;  %v924_v3 = vmul.f32 1.442695, %v837_v32  ;;  %v1199_v41 = vsel %vm213_vm0, %v3216_v35, 0.0 }
 0x21e   : > { %4746 = vst [vmem:[#allocation15_spill] sm:$0xff] %v3230_v51  ;;  %v3237_v18 = vpop.eup %2380  ;;  %2390 = vpow2.f32 %v998_v50  ;;  %1079 = vadd.xlane.f32.xlu1 %v1078_v0  ;;  %v1156_v52 = vadd.f32 %v3235_v29, %v3225_v31  ;;  %v793_v27 = vpop.xlane.xlu2 %792  ;;  %v1198_v0 = vsel %vm213_vm0, %v3205_v4, 0.0  ;;  %v986_v32 = vmul.f32 1.442695, %v868_v12  ;;  %v4763_v31 = vld [vmem:[#allocation35_spill] sm:$0xff] }
 0x21f   : > { %4748 = vst [vmem:[#allocation18_spill] sm:$0xff] %v3233_v28  ;;  %2392 = vpow2.f32 %v1000_v44  ;;  %v3247_v23 = vpop.xlane.xlu1 %1172  ;;  %v888_v25 = vsub.f32 %v2997_v21, %v793_v27  ;;  %v889_v2 = vsub.f32 %v2693_v7, %v793_v27  ;;  %v988_v27 = vmul.f32 1.442695, %v869_v10 }
 0x220   : > { %4749 = vst [vmem:[#allocation19_spill] sm:$0xff] %v3235_v29  ;;  %v3253_v50 = vpop.eup %2382  ;;  %1157 = vadd.xlane.f32.xlu2 %v1156_v52  ;;  %2394 = vrcp.f32 %v3247_v23  ;;  %v1200_v35 = vadd.f32 %v1199_v41, %v1198_v0  ;;  %v1081_v12 = vadd.f32 %v3170_v61, %v3167_v22  ;;  %vm1348_vm13 = vweird.f32 %v3211_v33 }
 0x221   : > { %4750 = vst [vmem:[#allocation26_spill] sm:$0xff] %v3237_v18  ;;  %v3260_v44 = vpop.eup %2384  ;;  %2396 = vpow2.f32 %v1006_v59  ;;  %v1344_v7 = vmul.f32 %v3253_v50, %v3211_v33  ;;  %v1026_v21 = vmul.f32 1.442695, %v888_v25  ;;  %v1028_v9 = vmul.f32 1.442695, %v889_v2 }
 0x222   : > { %1877 = vst [vmem:[%s3221_s25 + $0x90] sm:$0xff] %v3230_v51  ;;  %v3264_v26 = vpop.eup %2386  ;;  %2398 = vpow2.f32 %v1008_v39  ;;  %vm1349_vm12 = vweird.f32 %v3253_v50  ;;  %vm1642_vm1 = vweird.f32 %v3247_v23 }
 0x223   : > { %1878 = vst [vmem:[%s3221_s25 + $0x98] sm:$0xff] %v3233_v28  ;;  %v3266_v52 = vpop.eup %2388  ;;  %v1345_v42 = vsub.f32 1.0, %v1344_v7  ;;  %2400 = vpow2.f32 %v1026_v21  ;;  %v1354_v7 = vand.u32 2147483648, %v3211_v33  ;;  %vm1350_vm14 = vmor %vm1348_vm13, %vm1349_vm12 }
 0x224   : > { %4753 = vst [vmem:[#allocation27_spill] sm:$0xff] %v3260_v44  ;;  %v3268_v4 = vpop.eup %2390  ;;  %2402 = vpow2.f32 %v1028_v9  ;;  %v1159_v59 = vadd.f32 %v3266_v52, %v3264_v26 }
 0x225   : > { %4754 = vst [vmem:[#allocation28_spill] sm:$0xff] %v3264_v26  ;;  %v3272_v29 = vpop.eup %2392  ;;  %2404 = vpow2.f32 %v924_v3  ;;  %v1346_v39 = vmul.f32 %v3253_v50, %v1345_v42 }
 0x226   : > { %4755 = vst [vmem:[#allocation29_spill] sm:$0xff] %v3266_v52  ;;  %v3274_v25 = vpop.eup %2394  ;;  %2406 = vpow2.f32 %v986_v32  ;;  %1201 = vadd.xlane.f32.xlu1 %v1200_v35  ;;  %1160 = vadd.xlane.f32.xlu0 %v1159_v59  ;;  %v3279_v10 = vpop.xlane.xlu2 %816  ;;  %v1352_v35 = vand.u32 2147483647, %v3211_v33  ;;  %v3300_v32 = vadd.f32 %v3188_v6, %v3185_v49  ;;  %v4764_v33 = vld [vmem:[#allocation36_spill] sm:$0xff] }
 0x227   : > { %4756 = vst [vmem:[#allocation44_spill] sm:$0xff] %v3268_v4  ;;  %v3281_v2 = vpop.eup %2396  ;;  %2408 = vpow2.f32 %v988_v27  ;;  %v1638_v0 = vmul.f32 %v3274_v25, %v3247_v23  ;;  %v3285_v41 = vpop.xlane.xlu0 %1112  ;;  %v3304_v27 = vadd.f32 %v3196_v34, %v3191_v14  ;;  %v1347_v52 = vadd.f32 %v3253_v50, %v1346_v39 }
 0x228   : > { %4757 = vst [vmem:[#allocation32_spill] sm:$0xff] %v3272_v29  ;;  %v3287_v3 = vpop.xlane.xlu1 %1100  ;;  %v3290_v21 = vpop.eup %2398  ;;  %2410 = vrcp.f32 %v3285_v41  ;;  %1082 = vadd.xlane.f32.xlu2 %v1081_v12  ;;  %v1138_v12 = vadd.f32 %v3260_v44, %v3237_v18  ;;  %v3320_v34 = vadd.f32 %v3272_v29, %v3268_v4  ;;  %v1646_v44 = vand.u32 2147483647, %v3247_v23 }
 0x229   : > { %4758 = vst [vmem:[#allocation34_spill] sm:$0xff] %v3279_v10  ;;  %v3295_v9 = vpop.eup %2400  ;;  %2412 = vrcp.f32 %v3287_v3  ;;  %v1639_v59 = vsub.f32 1.0, %v1638_v0  ;;  %v1355_v0 = vor.u32 1.1754944e-38, %v1354_v7  ;;  %v1351_v6 = vsel %vm1350_vm14, %v3253_v50, %v1347_v52 }
 0x22a   : > { %4759 = vst [vmem:[#allocation7_spill] sm:$0xff] %v3281_v2  ;;  %v3306_v42 = vpop.eup %2402  ;;  %vm1353_vm15 = vcmp.eq.f32.partialorder %v1352_v35, 8.507059e+37  ;;  %v1648_v29 = vand.u32 2147483648, %v3247_v23  ;;  %v1147_v4 = vadd.f32 %v3290_v21, %v3281_v2  ;;  %v1366_v50 = vand.u32 2147483647, %v3285_v41  ;;  %v4766_v35 = vld [vmem:[#allocation43_spill] sm:$0xff] }
 0x22b   : > { %4760 = vst [vmem:[#allocation41_spill] sm:$0xff] %v3290_v21  ;;  %v3312_v26 = vpop.eup %2404  ;;  %v1162_v49 = vadd.f32 %v3306_v42, %v3295_v9  ;;  %v1356_v7 = vsel %vm1353_vm15, %v1355_v0, %v1351_v6  ;;  %v1368_v21 = vand.u32 2147483648, %v3285_v41  ;;  %vm3355_vm2 = vcmp.eq.f32.partialorder %v1646_v44, 8.507059e+37 }
 0x22c   : > { %4761 = vst [vmem:[#allocation42_spill] sm:$0xff] %v3295_v9  ;;  %v3324_v14 = vpop.eup %2406  ;;  %v1640_v9 = vmul.f32 %v3274_v25, %v1639_v59  ;;  %v3341_v52 = vmul.f32 %v2976_v17, %v1356_v7  ;;  %v3344_v61 = vmul.f32 %v4766_v35, %v1356_v7  ;;  %vm1643_vm3 = vweird.f32 %v3274_v25 }
 0x22d   : > { %4762 = vst [vmem:[#allocation22_spill] sm:$0xff] %v3306_v42  ;;  %v3330_v18 = vpop.eup %2408  ;;  %v1312_v44 = vand.u32 2147483648, %v3287_v3  ;;  %vm1362_vm4 = vweird.f32 %v3285_v41  ;;  %vm3375_vm5 = vcmp.eq.f32.partialorder %v1366_v50, 8.507059e+37  ;;  %vm3383_vm6 = vmor %vm1642_vm1, %vm1643_vm3  ;;  %vm1306_vm8 = vweird.f32 %v3287_v3 }
 0x22e   : > { %v3336_v42 = vpop.eup %2410  ;;  %1139 = vadd.xlane.f32.xlu1 %v1138_v12  ;;  %1163 = vadd.xlane.f32.xlu0 %v1162_v49  ;;  %v760_v39 = vpop.xlane.xlu2 %759  ;;  %4765 = vst [vmem:[#allocation23_spill] sm:$0xff] %v3341_v52  ;;  %v1641_v2 = vadd.f32 %v3274_v25, %v1640_v9 }
 0x22f   : > { %v3346_v22 = vpop.eup %2412  ;;  %v1358_v6 = vmul.f32 %v3336_v42, %v3285_v41  ;;  %v3350_v0 = vpop.xlane.xlu0 %1103  ;;  %v866_v49 = vsub.f32 %v2886_v57, %v760_v39  ;;  %v867_v12 = vsub.f32 %v2888_v63, %v760_v39  ;;  %1879 = vst [vmem:[%s3221_s25 + $0xa0] sm:$0xff] %v3341_v52  ;;  %v1310_v57 = vand.u32 2147483647, %v3287_v3 }
 0x230   : > { %v811_v59 = vpop.xlane.xlu1 %810  ;;  %v1302_v7 = vmul.f32 %v3346_v22, %v3287_v3  ;;  %2414 = vrcp.f32 %v3350_v0  ;;  %1148 = vadd.xlane.f32.xlu2 %v1147_v4  ;;  %1880 = vst [vmem:[%s3221_s25 + $0xa8] sm:$0xff] %v3344_v61  ;;  %v1649_v4 = vor.u32 1.1754944e-38, %v1648_v29  ;;  %vm1363_vm7 = vweird.f32 %v3336_v42 }
 0x231   : > { %v900_v35 = vsub.f32 %v2756_v38, %v811_v59  ;;  %v1359_v63 = vsub.f32 1.0, %v1358_v6  ;;  %v982_v39 = vmul.f32 1.442695, %v866_v49  ;;  %v984_v51 = vmul.f32 1.442695, %v867_v12  ;;  %vm1364_vm11 = vmor %vm1362_vm4, %vm1363_vm7 }
 0x232   : > { %v1303_v46 = vsub.f32 1.0, %v1302_v7  ;;  %v901_v52 = vsub.f32 %v2775_v47, %v811_v59  ;;  %v1369_v49 = vor.u32 1.1754944e-38, %v1368_v21  ;;  %vm3395_vm9 = vcmp.eq.f32.partialorder %v1310_v57, 8.507059e+37 }
 0x233   : > { %v1050_v28 = vmul.f32 1.442695, %v900_v35  ;;  %v1360_v38 = vmul.f32 %v3336_v42, %v1359_v63  ;;  %2416 = vpow2.f32 %v982_v39  ;;  %v1313_v9 = vor.u32 1.1754944e-38, %v1312_v44 }
 0x234   : > { %v1304_v10 = vmul.f32 %v3346_v22, %v1303_v46  ;;  %v1052_v59 = vmul.f32 1.442695, %v901_v52  ;;  %vm1320_vm10 = vweird.f32 %v3350_v0  ;;  %vm1307_vm12 = vweird.f32 %v3346_v22 }
 0x235   : > { %2418 = vpow2.f32 %v1050_v28  ;;  %v1361_v47 = vadd.f32 %v3336_v42, %v1360_v38  ;;  %v1645_v28 = vsel %vm3383_vm6, %v3274_v25, %v1641_v2  ;;  %vm1308_vm14 = vmor %vm1306_vm8, %vm1307_vm12  ;;  %v1326_v39 = vand.u32 2147483648, %v3350_v0 }
 0x236   : > { %v3390_v46 = vpop.eup %2414  ;;  %2420 = vpow2.f32 %v984_v51  ;;  %1190 = vadd.xlane.f32.xlu1 %v3300_v32  ;;  %v3393_v21 = vpop.xlane.xlu2 %1169  ;;  %v1305_v25 = vadd.f32 %v3346_v22, %v1304_v10  ;;  %v1324_v38 = vand.u32 2147483647, %v3350_v0 }
 0x237   : > { %v1316_v50 = vmul.f32 %v3390_v46, %v3350_v0  ;;  %v814_v12 = vpop.xlane.xlu0 %813  ;;  %2422 = vrcp.f32 %v3393_v21  ;;  %v1365_v35 = vsel %vm1364_vm11, %v3336_v42, %v1361_v47  ;;  %vm1321_vm13 = vweird.f32 %v3390_v46 }
 0x238   : > { %v808_v7 = vpop.xlane.xlu1 %807  ;;  %v902_v51 = vsub.f32 %v2769_v45, %v814_v12  ;;  %v903_v32 = vsub.f32 %v2788_v53, %v814_v12  ;;  %1142 = vadd.xlane.f32.xlu2 %v3320_v34  ;;  %v3419_v45 = vsel %vm3355_vm2, %v1649_v4, %v1645_v28  ;;  %v1370_v10 = vsel %vm3375_vm5, %v1369_v49, %v1365_v35  ;;  %vm3464_vm15 = vmor %vm1320_vm10, %vm1321_vm13  ;;  %v4779_v35 = vld [vmem:[#allocation30_spill] sm:$0xff] }
 0x239   : > { %v1317_v2 = vsub.f32 1.0, %v1316_v50  ;;  %v898_v52 = vsub.f32 %v2741_v30, %v808_v7  ;;  %v3421_v53 = vpop.eup %2416  ;;  %v899_v57 = vsub.f32 %v2762_v40, %v808_v7  ;;  %v3431_v17 = vmul.f32 %v3010_v56, %v1370_v10 }
 0x23a   : > { %v1054_v34 = vmul.f32 1.442695, %v902_v51  ;;  %v1056_v42 = vmul.f32 1.442695, %v903_v32  ;;  %v3434_v63 = vmul.f32 %v3014_v48, %v1370_v10  ;;  %2424 = vpow2.f32 %v1052_v59 }
 0x23b   : > { %v3427_v41 = vpop.eup %2418  ;;  %v1318_v30 = vmul.f32 %v3390_v46, %v1317_v2  ;;  %v1309_v44 = vsel %vm1308_vm14, %v3346_v22, %v1305_v25  ;;  %v1839_v56 = vmul.f32 %v2990_v5, %v3419_v45  ;;  %1881 = vst [vmem:[%s3221_s25 + $0xb0] sm:$0xff] %v3431_v17  ;;  %v1046_v22 = vmul.f32 1.442695, %v898_v52 }
 0x23c   : > { %v3440_v40 = vpop.eup %2420  ;;  %v1314_v6 = vsel %vm3395_vm9, %v1313_v9, %v1309_v44  ;;  %2426 = vpow2.f32 %v1054_v34  ;;  %1882 = vst [vmem:[%s3221_s25 + $0xb8] sm:$0xff] %v3434_v63  ;;  %v1048_v23 = vmul.f32 1.442695, %v899_v57  ;;  %v1327_v59 = vor.u32 1.1754944e-38, %v1326_v39 }
 0x23d   : > { %v3446_v4 = vpop.eup %2422  ;;  %v1129_v48 = vadd.f32 %v3440_v40, %v3421_v53  ;;  %v1319_v3 = vadd.f32 %v3390_v46, %v1318_v30  ;;  %v3469_v29 = vmul.f32 %v3004_v54, %v1314_v6  ;;  %v3472_v47 = vmul.f32 %v3006_v62, %v1314_v6  ;;  %1921 = vst [vmem:[%s3221_s25 + $0x1f0] sm:$0xff] %v1839_v56 }
 0x23e   : > { %v3456_v49 = vpop.xlane.xlu2 %1097  ;;  %2428 = vpow2.f32 %v1056_v42  ;;  %v1624_v9 = vmul.f32 %v3446_v4, %v3393_v21  ;;  %v4777_v54 = vsub.f32 %v4763_v31, %v3136_v11  ;;  %v3494_v12 = vadd.f32 %v3312_v26, %v3180_v36 }
 0x23f   : > { %1130 = vadd.xlane.f32.xlu1 %v1129_v48  ;;  %v3476_v28 = vpop.xlane.xlu0 %1115  ;;  %v1323_v50 = vsel %vm3464_vm15, %v3390_v46, %v1319_v3  ;;  %1873 = vst [vmem:[%s3221_s25 + $0x70] sm:$0xff] %v3469_v29  ;;  %vm1325_vm1 = vcmp.eq.f32.partialorder %v1324_v38, 8.507059e+37  ;;  %v4778_v31 = vsub.f32 %v4764_v33, %v3136_v11  ;;  %v4780_v33 = vld [vmem:[#allocation31_spill] sm:$0xff]  ;;  %v1132_v57 = vadd.f32 %v3330_v18, %v3324_v14 }
 0x240   : > { %v3478_v0 = vpop.xlane.xlu1 %804  ;;  %v1010_v62 = vmul.f32 1.442695, %v4777_v54  ;;  %2430 = vrcp.f32 %v3476_v28  ;;  %1193 = vadd.xlane.f32.xlu2 %v3304_v27  ;;  %1874 = vst [vmem:[%s3221_s25 + $0x78] sm:$0xff] %v3472_v47  ;;  %v3498_v46 = vpop.eup %2424  ;;  %v1634_v27 = vand.u32 2147483648, %v3393_v21  ;;  %v1328_v51 = vsel %vm1325_vm1, %v1327_v59, %v1323_v50 }
 0x241   : > { %2432 = vrcp.f32 %v3456_v49  ;;  %v1012_v7 = vmul.f32 1.442695, %v4778_v31  ;;  %v1625_v32 = vsub.f32 1.0, %v1624_v9  ;;  %v3505_v25 = vmul.f32 %v3022_v19, %v1328_v51 }
 0x242   : > { %2434 = vpow2.f32 %v1046_v22  ;;  %v3508_v2 = vmul.f32 %v3026_v43, %v1328_v51  ;;  %v3510_v52 = vpop.eup %2426  ;;  %v1180_v19 = vadd.f32 %v3498_v46, %v3427_v41  ;;  %v1380_v43 = vand.u32 2147483647, %v3476_v28 }
 0x243   : > { %2436 = vpow2.f32 %v1048_v23  ;;  %v1382_v30 = vand.u32 2147483648, %v3476_v28  ;;  %1875 = vst [vmem:[%s3221_s25 + $0x80] sm:$0xff] %v3505_v25  ;;  %v1840_v42 = vmul.f32 %v2994_v16, %v3419_v45  ;;  %v3530_v44 = vor.u32 1.1754944e-38, %v1634_v27 }
 0x244   : > { %2438 = vpow2.f32 %v1010_v62  ;;  %v3518_v10 = vpop.eup %2428  ;;  %vm1376_vm2 = vweird.f32 %v3476_v28  ;;  %1876 = vst [vmem:[%s3221_s25 + $0x88] sm:$0xff] %v3508_v2  ;;  %v1296_v48 = vand.u32 2147483647, %v3456_v49  ;;  %v1626_v38 = vmul.f32 %v3446_v4, %v1625_v32 }
 0x245   : > { %2440 = vpow2.f32 %v1012_v7  ;;  %vm1292_vm3 = vweird.f32 %v3456_v49  ;;  %v1298_v22 = vand.u32 2147483648, %v3456_v49  ;;  %1922 = vst [vmem:[%s3221_s25 + $0x1f8] sm:$0xff] %v1840_v42  ;;  %v1183_v59 = vadd.f32 %v3518_v10, %v3510_v52 }
 0x246   : > { %v3528_v39 = vpop.eup %2430  ;;  %v3532_v56 = vpop.xlane.xlu2 %1094  ;;  %vm3560_vm4 = vcmp.eq.f32.partialorder %v1380_v43, 8.507059e+37  ;;  %v1383_v7 = vor.u32 1.1754944e-38, %v1382_v30  ;;  %vm3566_vm5 = vcmp.eq.f32.partialorder %v1296_v48, 8.507059e+37  ;;  %vm1628_vm6 = vweird.f32 %v3393_v21 }
 0x247   : > { %v3538_v3 = vpop.eup %2432  ;;  %v1372_v16 = vmul.f32 %v3528_v39, %v3476_v28  ;;  %1181 = vadd.xlane.f32.xlu1 %v1180_v19  ;;  %v796_v45 = vpop.xlane.xlu0 %795  ;;  %2442 = vrcp.f32 %v3532_v56  ;;  %vm1377_vm7 = vweird.f32 %v3528_v39  ;;  %v3574_v19 = vadd.f32 %v3446_v4, %v1626_v38 }
 0x248   : > { %v3543_v6 = vpop.xlane.xlu1 %1088  ;;  %v3549_v5 = vpop.eup %2434  ;;  %v1288_v23 = vmul.f32 %v3538_v3, %v3456_v49  ;;  %1133 = vadd.xlane.f32.xlu2 %v1132_v57  ;;  %v890_v9 = vsub.f32 %v3086_v20, %v796_v45  ;;  %v891_v50 = vsub.f32 %v2706_v13, %v796_v45  ;;  %vm1629_vm8 = vweird.f32 %v3446_v4  ;;  %vm3599_vm10 = vmor %vm1376_vm2, %vm1377_vm7 }
 0x249   : > { %2444 = vrcp.f32 %v3543_v6  ;;  %v3556_v54 = vpop.eup %2436  ;;  %v1373_v62 = vsub.f32 1.0, %v1372_v16  ;;  %v1299_v48 = vor.u32 1.1754944e-38, %v1298_v22  ;;  %vm1293_vm9 = vweird.f32 %v3538_v3  ;;  %vm3660_vm1 = vmor %vm1628_vm6, %vm1629_vm8 }
 0x24a   : > { %v3564_v27 = vpop.eup %2438  ;;  %v1289_v51 = vsub.f32 1.0, %v1288_v23  ;;  %v1030_v32 = vmul.f32 1.442695, %v890_v9  ;;  %v1032_v20 = vmul.f32 1.442695, %v891_v50  ;;  %v3582_v42 = vadd.f32 %v3556_v54, %v3549_v5  ;;  %vm1294_vm12 = vmor %vm1292_vm3, %vm1293_vm9 }
 0x24b   : > { %v1374_v57 = vmul.f32 %v3528_v39, %v1373_v62  ;;  %v3577_v43 = vpop.eup %2440  ;;  %vm1278_vm11 = vweird.f32 %v3532_v56  ;;  %vm1250_vm13 = vweird.f32 %v3543_v6 }
 0x24c   : > { %v1290_v30 = vmul.f32 %v3538_v3, %v1289_v51  ;;  %2446 = vpow2.f32 %v1030_v32  ;;  %v1282_v51 = vand.u32 2147483647, %v3532_v56 }
 0x24d   : > { %v3584_v16 = vpop.eup %2442  ;;  %2448 = vpow2.f32 %v1032_v20  ;;  %v1375_v45 = vadd.f32 %v3528_v39, %v1374_v57  ;;  %v1284_v57 = vand.u32 2147483648, %v3532_v56 }
 0x24e   : > { %v1274_v9 = vmul.f32 %v3584_v16, %v3532_v56  ;;  %v3593_v50 = vpop.xlane.xlu2 %1091  ;;  %v1291_v62 = vadd.f32 %v3538_v3, %v1290_v30  ;;  %v1254_v30 = vand.u32 2147483647, %v3543_v6  ;;  %vm1279_vm14 = vweird.f32 %v3584_v16 }
 0x24f   : > { %v3589_v23 = vpop.eup %2444  ;;  %v3608_v20 = vpop.xlane.xlu0 %1118  ;;  %2450 = vrcp.f32 %v3593_v50  ;;  %v1379_v28 = vsel %vm3599_vm10, %v3528_v39, %v1375_v45  ;;  %vm3641_vm15 = vcmp.eq.f32.partialorder %v1282_v51, 8.507059e+37  ;;  %vm3670_vm2 = vmor %vm1278_vm11, %vm1279_vm14  ;;  %vm1264_vm3 = vweird.f32 %v3593_v50 }
 0x250   : > { %v1246_v32 = vmul.f32 %v3589_v23, %v3543_v6  ;;  %v1275_v34 = vsub.f32 1.0, %v1274_v9  ;;  %1184 = vadd.xlane.f32.xlu2 %v1183_v59  ;;  %2452 = vrcp.f32 %v3608_v20  ;;  %v1384_v39 = vsel %vm3560_vm4, %v1383_v7, %v1379_v28 }
 0x251   : > { %v1295_v45 = vsel %vm1294_vm12, %v3538_v3, %v1291_v62  ;;  %v1256_v59 = vand.u32 2147483648, %v3543_v6  ;;  %v3630_v49 = vmul.f32 %v3062_v60, %v1384_v39  ;;  %v3633_v38 = vmul.f32 %v3066_v1, %v1384_v39 }
 0x252   : > { %v1247_v11 = vsub.f32 1.0, %v1246_v32  ;;  %v3626_v9 = vpop.eup %2446  ;;  %v1276_v22 = vmul.f32 %v3584_v16, %v1275_v34  ;;  %v1300_v3 = vsel %vm3566_vm5, %v1299_v48, %v1295_v45  ;;  %v1285_v34 = vor.u32 1.1754944e-38, %v1284_v57 }
 0x253   : > { %v3636_v32 = vpop.eup %2448  ;;  %1883 = vst [vmem:[%s3221_s25 + $0xc0] sm:$0xff] %v3630_v49  ;;  %v3650_v1 = vmul.f32 %v3058_v24, %v1300_v3  ;;  %v3653_v62 = vmul.f32 %v3060_v15, %v1300_v3  ;;  %vm3675_vm4 = vcmp.eq.f32.partialorder %v1254_v30, 8.507059e+37  ;;  %v1257_v51 = vor.u32 1.1754944e-38, %v1256_v59 }
 0x254   : > { %v1248_v31 = vmul.f32 %v3589_v23, %v1247_v11  ;;  %v1165_v60 = vadd.f32 %v3636_v32, %v3626_v9  ;;  %v1277_v11 = vadd.f32 %v3584_v16, %v1276_v22  ;;  %1884 = vst [vmem:[%s3221_s25 + $0xc8] sm:$0xff] %v3633_v38  ;;  %v1631_v28 = vsel %vm3660_vm1, %v3446_v4, %v3574_v19 }
 0x255   : > { %v3664_v48 = vpop.eup %2450  ;;  %1871 = vst [vmem:[%s3221_s25 + $0x60] sm:$0xff] %v3650_v1  ;;  %vm1251_vm5 = vweird.f32 %v3589_v23  ;;  %v1394_v19 = vand.u32 2147483647, %v3608_v20  ;;  %v1396_v59 = vand.u32 2147483648, %v3608_v20  ;;  %vm1390_vm10 = vweird.f32 %v3608_v20 }
 0x256   : > { %v3683_v57 = vpop.eup %2452  ;;  %v1260_v56 = vmul.f32 %v3664_v48, %v3593_v50  ;;  %1166 = vadd.xlane.f32.xlu0 %v1165_v60  ;;  %v1281_v30 = vsel %vm3670_vm2, %v3584_v16, %v1277_v11  ;;  %v1249_v39 = vadd.f32 %v3589_v23, %v1248_v31  ;;  %1872 = vst [vmem:[%s3221_s25 + $0x68] sm:$0xff] %v3653_v62  ;;  %v1268_v16 = vand.u32 2147483647, %v3593_v50  ;;  %vm1252_vm6 = vmor %vm1250_vm13, %vm1251_vm5 }
 0x257   : > { %v1386_v45 = vmul.f32 %v3683_v57, %v3608_v20  ;;  %v3696_v4 = vpop.xlane.xlu0 %1121  ;;  %v1286_v22 = vsel %vm3641_vm15, %v1285_v34, %v1281_v30  ;;  %v1270_v31 = vand.u32 2147483648, %v3593_v50  ;;  %vm1265_vm8 = vweird.f32 %v3664_v48  ;;  %v4798_v30 = vld [vmem:[#allocation45_spill] sm:$0xff] }
 0x258   : > { %v1261_v3 = vsub.f32 1.0, %v1260_v56  ;;  %1178 = vadd.xlane.f32.xlu2 %v3582_v42  ;;  %2454 = vrcp.f32 %v3696_v4  ;;  %v3709_v11 = vmul.f32 %v3080_v55, %v1286_v22  ;;  %v3712_v13 = vmul.f32 %v3082_v8, %v1286_v22  ;;  %v4796_v56 = vld [vmem:[#allocation46_spill] sm:$0xff]  ;;  %vm1266_vm11 = vmor %vm1264_vm3, %vm1265_vm8 }
 0x259   : > { %v1387_v60 = vsub.f32 1.0, %v1386_v45  ;;  %v4795_v42 = vand.u32 2147483647, %v3393_v21  ;;  %v1253_v34 = vsel %vm1252_vm6, %v3589_v23, %v1249_v39  ;;  %vm1391_vm9 = vweird.f32 %v3683_v57 }
 0x25a   : > { %v1262_v7 = vmul.f32 %v3664_v48, %v1261_v3  ;;  %1869 = vst [vmem:[%s3221_s25 + $0x50] sm:$0xff] %v3709_v11  ;;  %v1258_v6 = vsel %vm3675_vm4, %v1257_v51, %v1253_v34  ;;  %v4799_v45 = vsub.f32 %v4779_v35, %v3124_v37  ;;  %v4800_v3 = vsub.f32 %v4780_v33, %v3124_v37  ;;  %vm3757_vm12 = vmor %vm1390_vm10, %vm1391_vm9 }
 0x25b   : > { %vm1633_vm7 = vcmp.eq.f32.partialorder %v4795_v42, 8.507059e+37  ;;  %v1388_v8 = vmul.f32 %v3683_v57, %v1387_v60  ;;  %1870 = vst [vmem:[%s3221_s25 + $0x58] sm:$0xff] %v3712_v13  ;;  %v3735_v23 = vmul.f32 %v4796_v56, %v1258_v6  ;;  %vm1269_vm13 = vcmp.eq.f32.partialorder %v1268_v16, 8.507059e+37  ;;  %v4803_v42 = vld [vmem:[#allocation56_spill] sm:$0xff]  ;;  %v4808_v56 = vld [vmem:[#allocation51_spill] sm:$0xff] }
 0x25c   : > { %v1636_v55 = vsel %vm1633_vm7, %v3530_v44, %v1631_v28  ;;  %v1263_v24 = vadd.f32 %v3664_v48, %v1262_v7  ;;  %v4797_v44 = vld [vmem:[#allocation47_spill] sm:$0xff]  ;;  %v1002_v15 = vmul.f32 1.442695, %v4799_v45  ;;  %v1004_v60 = vmul.f32 1.442695, %v4800_v3  ;;  %v4804_v7 = vld [vmem:[#allocation16_spill] sm:$0xff] }
 0x25d   : > { %v1837_v21 = vmul.f32 %v3040_v58, %v1636_v55  ;;  %v3738_v28 = vmul.f32 %v4797_v44, %v1258_v6  ;;  %v1838_v39 = vmul.f32 %v4798_v30, %v1636_v55  ;;  %v1389_v51 = vadd.f32 %v3683_v57, %v1388_v8  ;;  %1865 = vst [vmem:[%s3221_s25 + $0x30] sm:$0xff] %v3735_v23  ;;  %v4809_v30 = vld [vmem:[#allocation49_spill] sm:$0xff] }
 0x25e   : > { %v1271_v58 = vor.u32 1.1754944e-38, %v1270_v31  ;;  %v2455_v22 = vpop.eup %2454  ;;  %1085 = vadd.xlane.f32.xlu0 %v3494_v12  ;;  %v1267_v50 = vsel %vm1266_vm11, %v3664_v48, %v1263_v24  ;;  %v1397_v12 = vor.u32 1.1754944e-38, %v1396_v59  ;;  %v910_v34 = vsub.f32 %v4804_v7, %v4803_v42  ;;  %v4805_v48 = vld [vmem:[#allocation17_spill] sm:$0xff] }
 0x25f   : > { %1919 = vst [vmem:[%s3221_s25 + $0x1e0] sm:$0xff] %v1837_v21  ;;  %v1400_v20 = vmul.f32 %v2455_v22, %v3696_v4  ;;  %v3765_v31 = vpop.xlane.xlu0 %1124  ;;  %v1393_v37 = vsel %vm3757_vm12, %v3683_v57, %v1389_v51  ;;  %v911_v16 = vsub.f32 %v4805_v48, %v4803_v42  ;;  %vm1395_vm14 = vcmp.eq.f32.partialorder %v1394_v19, 8.507059e+37  ;;  %v4806_v57 = vld [vmem:[#allocation48_spill] sm:$0xff]  ;;  %v4807_v21 = vld [vmem:[#allocation50_spill] sm:$0xff] }
 0x260   : > { %v1272_v33 = vsel %vm1269_vm13, %v1271_v58, %v1267_v50  ;;  %1866 = vst [vmem:[%s3221_s25 + $0x38] sm:$0xff] %v3738_v28  ;;  %2456 = vrcp.f32 %v3765_v31  ;;  %v1398_v8 = vsel %vm1395_vm14, %v1397_v12, %v1393_v37  ;;  %v1410_v6 = vand.u32 2147483648, %v3696_v4  ;;  %v4810_v42 = vld [vmem:[#allocation52_spill] sm:$0xff] }
 0x261   : > { %1920 = vst [vmem:[%s3221_s25 + $0x1e8] sm:$0xff] %v1838_v39  ;;  %2458 = vpow2.f32 %v1002_v15  ;;  %v1401_v55 = vsub.f32 1.0, %v1400_v20  ;;  %v3779_v59 = vmul.f32 %v4806_v57, %v1272_v33  ;;  %v3783_v24 = vmul.f32 %v4807_v21, %v1398_v8 }
 0x262   : > { %v3786_v44 = vmul.f32 %v4808_v56, %v1398_v8  ;;  %v3789_v45 = vmul.f32 %v4809_v30, %v1272_v33  ;;  %2460 = vpow2.f32 %v1004_v60  ;;  %vm1405_vm15 = vweird.f32 %v2455_v22 }
 0x263   : > { %v1402_v19 = vmul.f32 %v2455_v22, %v1401_v55  ;;  %v1408_v39 = vand.u32 2147483647, %v3696_v4  ;;  %1867 = vst [vmem:[%s3221_s25 + $0x40] sm:$0xff] %v3779_v59  ;;  %v1150_v15 = vadd.f32 %v3577_v43, %v3564_v27  ;;  %v1070_v51 = vmul.f32 1.442695, %v910_v34  ;;  %v4811_v34 = vld [vmem:[#allocation53_spill] sm:$0xff] }
 0x264   : > { %1885 = vst [vmem:[%s3221_s25 + $0xd0] sm:$0xff] %v3783_v24  ;;  %vm1404_vm1 = vweird.f32 %v3696_v4  ;;  %v1072_v60 = vmul.f32 1.442695, %v911_v16  ;;  %v1411_v35 = vor.u32 1.1754944e-38, %v1410_v6  ;;  %v4812_v16 = vld [vmem:[#allocation57_spill] sm:$0xff]  ;;  %v4813_v55 = vld [vmem:[#allocation24_spill] sm:$0xff]  ;;  %vm1418_vm5 = vweird.f32 %v3765_v31 }
 0x265   : > { %v1403_v58 = vadd.f32 %v2455_v22, %v1402_v19  ;;  %1886 = vst [vmem:[%s3221_s25 + $0xd8] sm:$0xff] %v3786_v44  ;;  %vm1406_vm2 = vmor %vm1404_vm1, %vm1405_vm15  ;;  %vm1409_vm3 = vcmp.eq.f32.partialorder %v1408_v39, 8.507059e+37  ;;  %2462 = vpow2.f32 %v1070_v51  ;;  %v870_v8 = vsub.f32 %v4813_v55, %v4812_v16  ;;  %v4814_v6 = vld [vmem:[#allocation25_spill] sm:$0xff]  ;;  %v4819_v55 = vld [vmem:[#allocation12_spill] sm:$0xff] }
 0x266   : > { %v2457_v3 = vpop.eup %2456  ;;  %1151 = vadd.xlane.f32.xlu0 %v1150_v15  ;;  %1868 = vst [vmem:[%s3221_s25 + $0x48] sm:$0xff] %v3789_v45  ;;  %2464 = vpow2.f32 %v1072_v60  ;;  %v1424_v57 = vand.u32 2147483648, %v3765_v31  ;;  %v1422_v56 = vand.u32 2147483647, %v3765_v31 }
 0x267   : > { %v3803_v50 = vpop.eup %2458  ;;  %v1414_v20 = vmul.f32 %v2457_v3, %v3765_v31  ;;  %v1407_v37 = vsel %vm1406_vm2, %v2455_v22, %v1403_v58  ;;  %v871_v22 = vsub.f32 %v4814_v6, %v4812_v16  ;;  %vm1419_vm4 = vweird.f32 %v2457_v3  ;;  %v4817_v31 = vld [vmem:[#allocation34_spill] sm:$0xff] }
 0x268   : > { %v1412_v12 = vsel %vm1409_vm3, %v1411_v35, %v1407_v37  ;;  %v3806_v33 = vpop.eup %2460  ;;  %v990_v39 = vmul.f32 1.442695, %v870_v8  ;;  %vm1420_vm6 = vmor %vm1418_vm5, %vm1419_vm4  ;;  %v1425_v15 = vor.u32 1.1754944e-38, %v1424_v57  ;;  %vm1423_vm7 = vcmp.eq.f32.partialorder %v1422_v56, 8.507059e+37  ;;  %v4815_v37 = vld [vmem:[#allocation54_spill] sm:$0xff] }
 0x269   : > { %v1415_v4 = vsub.f32 1.0, %v1414_v20  ;;  %v1805_v7 = vmul.f32 %v4810_v42, %v1412_v12  ;;  %v1806_v48 = vmul.f32 %v4811_v34, %v1412_v12  ;;  %v1144_v30 = vadd.f32 %v3806_v33, %v3803_v50  ;;  %v4818_v34 = vld [vmem:[#allocation10_spill] sm:$0xff] }
 0x26a   : > { %v992_v58 = vmul.f32 1.442695, %v871_v22  ;;  %2466 = vpow2.f32 %v990_v39  ;;  %v904_v16 = vsub.f32 %v4818_v34, %v4817_v31  ;;  %v905_v8 = vsub.f32 %v4819_v55, %v4817_v31  ;;  %v757_v22 = vpop.xlane.xlu0 %756  ;;  %v4821_v39 = vld [vmem:[#allocation21_spill] sm:$0xff] }
 0x26b   : > { %v1416_v21 = vmul.f32 %v2457_v3, %v1415_v4  ;;  %1887 = vst [vmem:[%s3221_s25 + $0xe0] sm:$0xff] %v1805_v7  ;;  %v3821_v51 = vpop.eup %2462  ;;  %v4816_v4 = vld [vmem:[#allocation55_spill] sm:$0xff] }
 0x26c   : > { %1888 = vst [vmem:[%s3221_s25 + $0xe8] sm:$0xff] %v1806_v48  ;;  %v3823_v35 = vpop.eup %2464  ;;  %2468 = vpow2.f32 %v992_v58  ;;  %v1058_v57 = vmul.f32 1.442695, %v904_v16  ;;  %v1060_v6 = vmul.f32 1.442695, %v905_v8 }
 0x26d   : > { %v1417_v19 = vadd.f32 %v2457_v3, %v1416_v21 }
 0x26e   : > { %1145 = vadd.xlane.f32.xlu0 %v1144_v30  ;;  %2470 = vpow2.f32 %v1058_v57  ;;  %v4820_v30 = vld [vmem:[#allocation20_spill] sm:$0xff] }
 0x26f   : > { %v1421_v60 = vsel %vm1420_vm6, %v2457_v3, %v1417_v19  ;;  %v1195_v3 = vadd.f32 %v3823_v35, %v3821_v51  ;;  %v864_v19 = vsub.f32 %v4820_v30, %v757_v22  ;;  %2472 = vpow2.f32 %v1060_v6 }
 0x270   : > { %v1426_v20 = vsel %vm1423_vm7, %v1425_v15, %v1421_v60  ;;  %v3835_v21 = vpop.eup %2466  ;;  %v865_v15 = vsub.f32 %v4821_v39, %v757_v22 }
 0x271   : > { %v1807_v12 = vmul.f32 %v4815_v37, %v1426_v20  ;;  %v1808_v42 = vmul.f32 %v4816_v4, %v1426_v20  ;;  %v978_v60 = vmul.f32 1.442695, %v864_v19  ;;  %v4824_v37 = vld [vmem:[#allocation8_spill] sm:$0xff] }
 0x272   : > { %v3837_v56 = vpop.eup %2468 }
 0x273   : > { %1889 = vst [vmem:[%s3221_s25 + $0xf0] sm:$0xff] %v1807_v12  ;;  %1946 = vmatpush.xpose.msrb.mxu2 %v1807_v12  ;;  %1966 = vmatpush.xpose.msrb.mxu3 %v1808_v42  ;;  %v1135_v58 = vadd.f32 %v3837_v56, %v3835_v21  ;;  %v896_v12 = vsub.f32 %v4824_v37, %v3478_v0  ;;  %2474 = vpow2.f32 %v978_v60 }
 0x274   : > { %1890 = vst [vmem:[%s3221_s25 + $0xf8] sm:$0xff] %v1808_v42  ;;  %v4826_v42 = vld [vmem:[#allocation23_spill] sm:$0xff] }
 0x276   : > { %1196 = vadd.xlane.f32.xlu0 %v1195_v3 }
 0x277   : > { %1947 = vmatpush.xpose.msrb.mxu2 %v1805_v7  ;;  %1967 = vmatpush.xpose.msrb.mxu3 %v1806_v48  ;;  %v980_v7 = vmul.f32 1.442695, %v865_v15  ;;  %v3847_v48 = vpop.eup %2470 }
 0x278   : > { %4822 = vst [vmem:[#allocation35_spill] sm:$0xff] %v3847_v48  ;;  %v3849_v20 = vpop.eup %2472 }
 0x279   : > { %4823 = vst [vmem:[#allocation36_spill] sm:$0xff] %v3849_v20  ;;  %2476 = vpow2.f32 %v980_v7  ;;  %v3861_v31 = vpop.eup %2474 }
 0x27a   : > { %4827 = vst [vmem:[#allocation43_spill] sm:$0xff] %v3861_v31 }
 0x27b   : > { %1948 = vmatpush.xpose.msrb.mxu2 %v3783_v24  ;;  %1968 = vmatpush.xpose.msrb.mxu3 %v3786_v44  ;;  %v4825_v24 = vld [vmem:[#allocation9_spill] sm:$0xff] }
 0x27c   : > { %v897_v44 = vsub.f32 %v4825_v24, %v3478_v0 }
 0x27e   : > { %1136 = vadd.xlane.f32.xlu0 %v1135_v58  ;;  %v1044_v4 = vmul.f32 1.442695, %v897_v44 }
 0x27f   : > { %1949 = vmatpush.xpose.msrb.mxu2 %v3630_v49  ;;  %1969 = vmatpush.xpose.msrb.mxu3 %v3633_v38  ;;  %v1186_v49 = vadd.f32 %v3849_v20, %v3847_v48  ;;  %v1042_v38 = vmul.f32 1.442695, %v896_v12  ;;  %v3863_v34 = vpop.eup %2476  ;;  %v4855_v20 = vld [vmem:[#allocation33_spill] sm:$0xff]  ;;  %v4856_v48 = vld [vmem:[#allocation4_spill] sm:$0xff] }
 0x280   : > { %4828 = vst [vmem:[#allocation30_spill] sm:$0xff] %v3863_v34  ;;  %v1126_v16 = vadd.f32 %v3863_v34, %v3861_v31 }
 0x281   : > { %2478 = vpow2.f32 %v1042_v38 }
 0x283   : > { %1950 = vmatpush.xpose.msrb.mxu2 %v3431_v17  ;;  %1970 = vmatpush.xpose.msrb.mxu3 %v3434_v63  ;;  %v4829_v17 = vld [vmem:[#allocation15_spill] sm:$0xff]  ;;  %v4830_v63 = vld [vmem:[#allocation18_spill] sm:$0xff] }
 0x286   : > { %1187 = vadd.xlane.f32.xlu0 %v1186_v49 }
 0x287   : > { %1951 = vmatpush.xpose.msrb.mxu2 %v4826_v42  ;;  %1971 = vmatpush.xpose.msrb.mxu3 %v3344_v61  ;;  %v3869_v55 = vpop.eup %2478 }
 0x288   : > { %4831 = vst [vmem:[#allocation31_spill] sm:$0xff] %v3869_v55 }
 0x289   : > { %v1155_v0 = vpop.xlane.xlu1 %1154 }
 0x28a   : > { %2480 = vrcp.f32 %v1155_v0  ;;  %v1564_v19 = vand.u32 2147483648, %v1155_v0  ;;  %vm1558_vm9 = vweird.f32 %v1155_v0  ;;  %v1562_v60 = vand.u32 2147483647, %v1155_v0 }
 0x28b   : > { %2482 = vpow2.f32 %v1044_v4  ;;  %1952 = vmatpush.xpose.msrb.mxu2 %v4829_v17  ;;  %1972 = vmatpush.xpose.msrb.mxu3 %v4830_v63  ;;  %v4835_v63 = vld [vmem:[#allocation5_spill] sm:$0xff] }
 0x28c   : > { %v1565_v37 = vor.u32 1.1754944e-38, %v1564_v19  ;;  %vm1563_vm11 = vcmp.eq.f32.partialorder %v1562_v60, 8.507059e+37 }
 0x28e   : > { %1127 = vadd.xlane.f32.xlu0 %v1126_v16 }
 0x28f   : > { %1953 = vmatpush.xpose.msrb.mxu2 %v3505_v25  ;;  %1973 = vmatpush.xpose.msrb.mxu3 %v3508_v2 }
 0x290   : > { %v2481_v61 = vpop.eup %2480 }
 0x291   : > { %v3873_v8 = vpop.eup %2482  ;;  %v1554_v3 = vmul.f32 %v2481_v61, %v1155_v0  ;;  %v1080_v57 = vpop.xlane.xlu1 %1079  ;;  %vm1559_vm8 = vweird.f32 %v2481_v61 }
 0x292   : > { %4832 = vst [vmem:[#allocation46_spill] sm:$0xff] %v3873_v8  ;;  %2484 = vrcp.f32 %v1080_v57  ;;  %v1174_v25 = vadd.f32 %v3873_v8, %v3869_v55  ;;  %vm3899_vm10 = vmor %vm1558_vm9, %vm1559_vm8  ;;  %v1214_v38 = vand.u32 2147483648, %v1080_v57  ;;  %vm1208_vm13 = vweird.f32 %v1080_v57  ;;  %v4862_v8 = vld [vmem:[#allocation19_spill] sm:$0xff] }
 0x293   : > { %v1555_v6 = vsub.f32 1.0, %v1554_v3  ;;  %v3875_v22 = vpop.xlane.xlu2 %1157  ;;  %1954 = vmatpush.xpose.msrb.mxu2 %v3469_v29  ;;  %1974 = vmatpush.xpose.msrb.mxu3 %v3472_v47 }
 0x294   : > { %2486 = vrcp.f32 %v3875_v22  ;;  %v1578_v49 = vand.u32 2147483648, %v3875_v22  ;;  %v1215_v19 = vor.u32 1.1754944e-38, %v1214_v38  ;;  %vm1572_vm15 = vweird.f32 %v3875_v22 }
 0x295   : > { %v1556_v30 = vmul.f32 %v2481_v61, %v1555_v6 }
 0x296   : > { %1175 = vadd.xlane.f32.xlu0 %v1174_v25 }
 0x297   : > { %1955 = vmatpush.xpose.msrb.mxu2 %v3650_v1  ;;  %1975 = vmatpush.xpose.msrb.mxu3 %v3653_v62  ;;  %v1557_v39 = vadd.f32 %v2481_v61, %v1556_v30  ;;  %v4848_v30 = vld [vmem:[#allocation3_spill] sm:$0xff] }
 0x298   : > { %v3884_v2 = vpop.eup %2484 }
 0x299   : > { %v1204_v29 = vmul.f32 %v3884_v2, %v1080_v57  ;;  %v3887_v15 = vpop.xlane.xlu1 %1201  ;;  %v3889_v47 = vpop.xlane.xlu0 %1160  ;;  %v1561_v24 = vsel %vm3899_vm10, %v2481_v61, %v1557_v39  ;;  %vm1209_vm12 = vweird.f32 %v3884_v2  ;;  %v4837_v61 = vld [vmem:[#allocation37_spill] sm:$0xff]  ;;  %v1576_v39 = vand.u32 2147483647, %v3875_v22 }
 0x29a   : > { %v3891_v58 = vpop.eup %2486  ;;  %2488 = vrcp.f32 %v3887_v15  ;;  %v1566_v42 = vsel %vm1563_vm11, %v1565_v37, %v1561_v24  ;;  %v1592_v7 = vand.u32 2147483648, %v3889_v47  ;;  %vm3947_vm1 = vmor %vm1208_vm13, %vm1209_vm12  ;;  %vm1586_vm2 = vweird.f32 %v3889_v47  ;;  %v4845_v37 = vld [vmem:[#allocation2_spill] sm:$0xff] }
 0x29b   : > { %v1205_v1 = vsub.f32 1.0, %v1204_v29  ;;  %2490 = vrcp.f32 %v3889_v47  ;;  %v3895_v62 = vpop.xlane.xlu2 %1082  ;;  %1956 = vmatpush.xpose.msrb.mxu2 %v3709_v11  ;;  %1976 = vmatpush.xpose.msrb.mxu3 %v3712_v13  ;;  %v1568_v12 = vmul.f32 %v3891_v58, %v3875_v22  ;;  %v1212_v11 = vand.u32 2147483647, %v1080_v57 }
 0x29c   : > { %2492 = vrcp.f32 %v3895_v62  ;;  %v1774_v13 = vand.u32 2147483648, %v3887_v15  ;;  %v3918_v16 = vmul.f32 %v4835_v63, %v1566_v42  ;;  %v3921_v3 = vmul.f32 %v4837_v61, %v1566_v42 }
 0x29d   : > { %v1206_v44 = vmul.f32 %v3884_v2, %v1205_v1  ;;  %v1569_v17 = vsub.f32 1.0, %v1568_v12  ;;  %vm3931_vm14 = vcmp.eq.f32.partialorder %v1212_v11, 8.507059e+37  ;;  %v1226_v38 = vand.u32 2147483647, %v3895_v62 }
 0x29e   : > { %4836 = vst [vmem:[#allocation47_spill] sm:$0xff] %v3918_v16  ;;  %v3953_v12 = vor.u32 1.1754944e-38, %v1774_v13  ;;  %vm1222_vm3 = vweird.f32 %v3895_v62  ;;  %vm3981_vm4 = vcmp.eq.f32.partialorder %v1576_v39, 8.507059e+37  ;;  %vm1573_vm7 = vweird.f32 %v3891_v58 }
 0x29f   : > { %1957 = vmatpush.xpose.msrb.mxu2 %v3779_v59  ;;  %1977 = vmatpush.xpose.msrb.mxu3 %v3789_v45  ;;  %v1207_v4 = vadd.f32 %v3884_v2, %v1206_v44  ;;  %4838 = vst [vmem:[#allocation45_spill] sm:$0xff] %v3921_v3  ;;  %v3925_v59 = vor.u32 1.1754944e-38, %v1578_v49  ;;  %v1570_v49 = vmul.f32 %v3891_v58, %v1569_v17  ;;  %vm3993_vm6 = vcmp.eq.f32.partialorder %v1226_v38, 8.507059e+37  ;;  %vm4045_vm12 = vmor %vm1572_vm15, %vm1573_vm7 }
 0x2a0   : > { %v3915_v0 = vpop.eup %2488  ;;  %1909 = vst [vmem:[%s3221_s25 + $0x190] sm:$0xff] %v3918_v16 }
 0x2a1   : > { %v3923_v6 = vpop.eup %2490  ;;  %v3927_v45 = vpop.xlane.xlu1 %1139  ;;  %v1211_v57 = vsel %vm3947_vm1, %v3884_v2, %v1207_v4  ;;  %1910 = vst [vmem:[%s3221_s25 + $0x198] sm:$0xff] %v3921_v3  ;;  %v3972_v13 = vmul.f32 %v3915_v0, %v3887_v15  ;;  %v1590_v2 = vand.u32 2147483647, %v3889_v47  ;;  %v1593_v4 = vor.u32 1.1754944e-38, %v1592_v7 }
 0x2a2   : > { %v3929_v25 = vpop.xlane.xlu0 %1163  ;;  %v3936_v29 = vpop.eup %2492  ;;  %v1582_v1 = vmul.f32 %v3923_v6, %v3889_v47  ;;  %2494 = vrcp.f32 %v3927_v45  ;;  %v1494_v42 = vand.u32 2147483648, %v3927_v45  ;;  %v1216_v17 = vsel %vm3931_vm14, %v1215_v19, %v1211_v57 }
 0x2a3   : > { %v1218_v24 = vmul.f32 %v3936_v29, %v3895_v62  ;;  %2496 = vrcp.f32 %v3929_v25  ;;  %v3958_v44 = vpop.xlane.xlu2 %1148  ;;  %1958 = vmatpush.xpose.msrb.mxu2 %v3735_v23  ;;  %1978 = vmatpush.xpose.msrb.mxu3 %v3738_v28  ;;  %v1228_v28 = vand.u32 2147483648, %v3895_v62  ;;  %vm1223_vm5 = vweird.f32 %v3936_v29 }
 0x2a4   : > { %v1583_v11 = vsub.f32 1.0, %v1582_v1  ;;  %2498 = vrcp.f32 %v3958_v44  ;;  %v3989_v7 = vmul.f32 %v4845_v37, %v1216_v17  ;;  %v3998_v19 = vmul.f32 %v4848_v30, %v1216_v17  ;;  %vm4026_vm10 = vmor %vm1222_vm3, %vm1223_vm5 }
 0x2a5   : > { %v1219_v23 = vsub.f32 1.0, %v1218_v24  ;;  %v1571_v39 = vadd.f32 %v3891_v58, %v1570_v49  ;;  %v1229_v38 = vor.u32 1.1754944e-38, %v1228_v28  ;;  %vm4010_vm8 = vcmp.eq.f32.partialorder %v1590_v2, 8.507059e+37 }
 0x2a6   : > { %v1584_v61 = vmul.f32 %v3923_v6, %v1583_v11  ;;  %v1765_v11 = vsub.f32 1.0, %v3972_v13  ;;  %1859 = vst [vmem:[%s3221_s25] sm:$0xff] %v3989_v7  ;;  %v4016_v49 = vor.u32 1.1754944e-38, %v1494_v42  ;;  %vm1600_vm9 = vweird.f32 %v3929_v25 }
 0x2a7   : > { %v1220_v1 = vmul.f32 %v3936_v29, %v1219_v23  ;;  %v1606_v13 = vand.u32 2147483648, %v3929_v25  ;;  %1860 = vst [vmem:[%s3221_s25 + $0x8] sm:$0xff] %v3998_v19  ;;  %vm1587_vm11 = vweird.f32 %v3923_v6  ;;  %vm1769_vm15 = vweird.f32 %v3915_v0 }
 0x2a8   : > { %v3991_v24 = vpop.eup %2494  ;;  %v1585_v55 = vadd.f32 %v3923_v6, %v1584_v61  ;;  %vm1588_vm14 = vmor %vm1586_vm2, %vm1587_vm11  ;;  %v1604_v60 = vand.u32 2147483647, %v3929_v25  ;;  %vm1768_vm1 = vweird.f32 %v3887_v15  ;;  %vm1530_vm5 = vweird.f32 %v3958_v44 }
 0x2a9   : > { %v4002_v57 = vpop.eup %2496  ;;  %v4005_v23 = vpop.xlane.xlu1 %1190  ;;  %v1221_v37 = vadd.f32 %v3936_v29, %v1220_v1  ;;  %v1484_v34 = vmul.f32 %v3991_v24, %v3927_v45 }
 0x2aa   : > { %v4014_v17 = vpop.eup %2498  ;;  %v1596_v30 = vmul.f32 %v4002_v57, %v3929_v25  ;;  %vm1601_vm13 = vweird.f32 %v4002_v57  ;;  %v1766_v25 = vmul.f32 %v3915_v0, %v1765_v11 }
 0x2ab   : > { %v1526_v2 = vmul.f32 %v4014_v17, %v3958_v44  ;;  %v4034_v42 = vpop.xlane.xlu2 %1142  ;;  %v1225_v1 = vsel %vm4026_vm10, %v3936_v29, %v1221_v37  ;;  %v1575_v29 = vsel %vm4045_vm12, %v3891_v58, %v1571_v39  ;;  %v1536_v37 = vand.u32 2147483648, %v3958_v44  ;;  %vm4089_vm2 = vmor %vm1600_vm9, %vm1601_vm13 }
 0x2ac   : > { %v1597_v31 = vsub.f32 1.0, %v1596_v30  ;;  %2500 = vrcp.f32 %v4034_v42  ;;  %v1230_v22 = vsel %vm3993_vm6, %v1229_v38, %v1225_v1  ;;  %v1485_v39 = vsub.f32 1.0, %v1484_v34  ;;  %v4857_v38 = vld [vmem:[#allocation14_spill] sm:$0xff]  ;;  %v4860_v34 = vld [vmem:[#allocation28_spill] sm:$0xff]  ;;  %vm4175_vm13 = vmor %vm1768_vm1, %vm1769_vm15 }
 0x2ad   : > { %v1527_v61 = vsub.f32 1.0, %v1526_v2  ;;  %2502 = vrcp.f32 %v4005_v23  ;;  %v4061_v30 = vmul.f32 %v4855_v20, %v1230_v22  ;;  %v4064_v3 = vmul.f32 %v4856_v48, %v1230_v22 }
 0x2ae   : > { %v1598_v28 = vmul.f32 %v4002_v57, %v1597_v31  ;;  %v1589_v31 = vsel %vm1588_vm14, %v3923_v6, %v1585_v55  ;;  %v1580_v20 = vsel %vm3981_vm4, %v3925_v59, %v1575_v29  ;;  %v4861_v59 = vld [vmem:[#allocation29_spill] sm:$0xff]  ;;  %vm1531_vm3 = vweird.f32 %v4014_v17 }
 0x2af   : > { %v1528_v58 = vmul.f32 %v4014_v17, %v1527_v61  ;;  %1861 = vst [vmem:[%s3221_s25 + $0x10] sm:$0xff] %v4061_v30  ;;  %v1594_v47 = vsel %vm4010_vm8, %v1593_v4, %v1589_v31  ;;  %v4082_v2 = vmul.f32 %v4857_v38, %v1580_v20  ;;  %v4100_v4 = vmul.f32 %v4862_v8, %v1580_v20  ;;  %vm1532_vm7 = vmor %vm1530_vm5, %vm1531_vm3  ;;  %v4866_v38 = vld [vmem:[#allocation42_spill] sm:$0xff] }
 0x2b0   : > { %v1599_v48 = vadd.f32 %v4002_v57, %v1598_v28  ;;  %1862 = vst [vmem:[%s3221_s25 + $0x18] sm:$0xff] %v4064_v3  ;;  %v4094_v6 = vmul.f32 %v4860_v34, %v1594_v47  ;;  %v4097_v63 = vmul.f32 %v4861_v59, %v1594_v47  ;;  %v1534_v22 = vand.u32 2147483647, %v3958_v44  ;;  %v4867_v34 = vld [vmem:[#allocation22_spill] sm:$0xff] }
 0x2b1   : > { %v1529_v1 = vadd.f32 %v4014_v17, %v1528_v58  ;;  %1911 = vst [vmem:[%s3221_s25 + $0x1a0] sm:$0xff] %v4082_v2  ;;  %vm1488_vm4 = vweird.f32 %v3927_v45  ;;  %v1607_v58 = vor.u32 1.1754944e-38, %v1606_v13  ;;  %v1486_v31 = vmul.f32 %v3991_v24, %v1485_v39 }
 0x2b2   : > { %v4103_v62 = vpop.eup %2500  ;;  %v4106_v29 = vpop.xlane.xlu1 %1130  ;;  %v1603_v61 = vsel %vm4089_vm2, %v4002_v57, %v1599_v48  ;;  %1913 = vst [vmem:[%s3221_s25 + $0x1b0] sm:$0xff] %v4094_v6  ;;  %v1537_v20 = vor.u32 1.1754944e-38, %v1536_v37  ;;  %vm1605_vm6 = vcmp.eq.f32.partialorder %v1604_v60, 8.507059e+37  ;;  %v4863_v44 = vand.u32 2147483647, %v3887_v15 }
 0x2b3   : > { %v4115_v28 = vpop.eup %2502  ;;  %v1498_v11 = vmul.f32 %v4103_v62, %v4034_v42  ;;  %2504 = vrcp.f32 %v4106_v29  ;;  %v4122_v57 = vpop.xlane.xlu2 %1193  ;;  %1914 = vst [vmem:[%s3221_s25 + $0x1b8] sm:$0xff] %v4097_v63  ;;  %v1508_v47 = vand.u32 2147483648, %v4034_v42  ;;  %v1608_v39 = vsel %vm1605_vm6, %v1607_v58, %v1603_v61 }
 0x2b4   : > { %2506 = vrcp.f32 %v4122_v57  ;;  %vm4134_vm8 = vcmp.eq.f32.partialorder %v4863_v44, 8.507059e+37  ;;  %1912 = vst [vmem:[%s3221_s25 + $0x1a8] sm:$0xff] %v4100_v4  ;;  %v1533_v37 = vsel %vm1532_vm7, %v4014_v17, %v1529_v1  ;;  %v1722_v60 = vmul.f32 %v4115_v28, %v4005_v23  ;;  %v4868_v17 = vld [vmem:[#allocation7_spill] sm:$0xff]  ;;  %v4870_v44 = vld [vmem:[#allocation41_spill] sm:$0xff] }
 0x2b5   : > { %v1499_v48 = vsub.f32 1.0, %v1498_v11  ;;  %v4145_v55 = vmul.f32 %v4866_v38, %v1608_v39  ;;  %v4148_v59 = vmul.f32 %v4867_v34, %v1608_v39  ;;  %vm1535_vm9 = vcmp.eq.f32.partialorder %v1534_v22, 8.507059e+37 }
 0x2b6   : > { %v1767_v8 = vadd.f32 %v3915_v0, %v1766_v25  ;;  %v1538_v58 = vsel %vm1535_vm9, %v1537_v20, %v1533_v37  ;;  %vm1503_vm10 = vweird.f32 %v4103_v62  ;;  %v1506_v22 = vand.u32 2147483647, %v4034_v42 }
 0x2b7   : > { %v1500_v61 = vmul.f32 %v4103_v62, %v1499_v48  ;;  %1915 = vst [vmem:[%s3221_s25 + $0x1c0] sm:$0xff] %v4145_v55  ;;  %v4156_v1 = vmul.f32 %v4868_v17, %v1538_v58  ;;  %v4159_v16 = vmul.f32 %v4870_v44, %v1538_v58  ;;  %vm1502_vm11 = vweird.f32 %v4034_v42 }
 0x2b8   : > { %1916 = vst [vmem:[%s3221_s25 + $0x1c8] sm:$0xff] %v4148_v59  ;;  %v1487_v20 = vadd.f32 %v3991_v24, %v1486_v31  ;;  %vm1489_vm12 = vweird.f32 %v3991_v24  ;;  %v1723_v38 = vsub.f32 1.0, %v1722_v60  ;;  %v1509_v34 = vor.u32 1.1754944e-38, %v1508_v47  ;;  %vm1504_vm15 = vmor %vm1502_vm11, %vm1503_vm10 }
 0x2b9   : > { %4869 = vst [vmem:[#allocation56_spill] sm:$0xff] %v4156_v1  ;;  %v2505_v39 = vpop.eup %2504  ;;  %v1501_v25 = vadd.f32 %v4103_v62, %v1500_v61  ;;  %vm1446_vm14 = vweird.f32 %v4106_v29  ;;  %v1492_v47 = vand.u32 2147483647, %v3927_v45  ;;  %v1771_v60 = vsel %vm4175_vm13, %v3915_v0, %v1767_v8  ;;  %vm4206_vm2 = vmor %vm1488_vm4, %vm1489_vm12 }
 0x2ba   : > { %4871 = vst [vmem:[#allocation16_spill] sm:$0xff] %v4159_v16  ;;  %v4169_v48 = vpop.eup %2506  ;;  %v1442_v58 = vmul.f32 %v2505_v39, %v4106_v29  ;;  %v4181_v61 = vpop.xlane.xlu1 %1181  ;;  %v1452_v44 = vand.u32 2147483648, %v4106_v29  ;;  %vm1507_vm1 = vcmp.eq.f32.partialorder %v1506_v22, 8.507059e+37  ;;  %v1491_v0 = vsel %vm4206_vm2, %v3991_v24, %v1487_v20 }
 0x2bb   : > { %1905 = vst [vmem:[%s3221_s25 + $0x170] sm:$0xff] %v4156_v1  ;;  %v1736_v31 = vmul.f32 %v4169_v48, %v4122_v57  ;;  %2508 = vrcp.f32 %v4181_v61  ;;  %v4188_v15 = vpop.xlane.xlu2 %1133  ;;  %v1450_v8 = vand.u32 2147483647, %v4106_v29  ;;  %vm1447_vm3 = vweird.f32 %v2505_v39  ;;  %v4876_v1 = vld [vmem:[#allocation44_spill] sm:$0xff] }
 0x2bc   : > { %1906 = vst [vmem:[%s3221_s25 + $0x178] sm:$0xff] %v4159_v16  ;;  %v1443_v17 = vsub.f32 1.0, %v1442_v58  ;;  %2510 = vrcp.f32 %v4188_v15  ;;  %v1505_v16 = vsel %vm1504_vm15, %v4103_v62, %v1501_v25  ;;  %v1776_v45 = vsel %vm4134_vm8, %v3953_v12, %v1771_v60  ;;  %v4877_v62 = vld [vmem:[#allocation32_spill] sm:$0xff]  ;;  %v4879_v60 = vld [vmem:[#allocation27_spill] sm:$0xff]  ;;  %vm1448_vm6 = vmor %vm1446_vm14, %vm1447_vm3 }
 0x2bd   : > { %v1737_v42 = vsub.f32 1.0, %v1736_v31  ;;  %v1510_v22 = vsel %vm1507_vm1, %v1509_v34, %v1505_v16  ;;  %vm1493_vm4 = vcmp.eq.f32.partialorder %v1492_v47, 8.507059e+37  ;;  %v1724_v24 = vmul.f32 %v4115_v28, %v1723_v38  ;;  %v4880_v38 = vld [vmem:[#allocation39_spill] sm:$0xff] }
 0x2be   : > { %v1444_v37 = vmul.f32 %v2505_v39, %v1443_v17  ;;  %v4220_v31 = vmul.f32 %v4876_v1, %v1510_v22  ;;  %v4223_v25 = vmul.f32 %v4877_v62, %v1510_v22  ;;  %vm1726_vm5 = vweird.f32 %v4005_v23  ;;  %v4878_v1 = vld [vmem:[#allocation26_spill] sm:$0xff] }
 0x2bf   : > { %v1738_v58 = vmul.f32 %v4169_v48, %v1737_v42  ;;  %v1746_v16 = vand.u32 2147483648, %v4122_v57  ;;  %v1496_v11 = vsel %vm1493_vm4, %v4016_v49, %v1491_v0  ;;  %v1453_v20 = vor.u32 1.1754944e-38, %v1452_v44  ;;  %v4881_v0 = vld [vmem:[#allocation40_spill] sm:$0xff] }
 0x2c0   : > { %v1445_v13 = vadd.f32 %v2505_v39, %v1444_v37  ;;  %1901 = vst [vmem:[%s3221_s25 + $0x150] sm:$0xff] %v4220_v31  ;;  %v4234_v34 = vmul.f32 %v4878_v1, %v1496_v11  ;;  %v4237_v47 = vmul.f32 %v4879_v60, %v1496_v11  ;;  %v4243_v17 = vmul.f32 %v4880_v38, %v1776_v45 }
 0x2c1   : > { %v4229_v12 = vpop.eup %2508  ;;  %1902 = vst [vmem:[%s3221_s25 + $0x158] sm:$0xff] %v4223_v25  ;;  %vm1451_vm7 = vcmp.eq.f32.partialorder %v1450_v8, 8.507059e+37  ;;  %v4252_v37 = vmul.f32 %v4881_v0, %v1776_v45  ;;  %v4883_v29 = vand.u32 2147483648, %v4005_v23  ;;  %vm1740_vm8 = vweird.f32 %v4122_v57 }
 0x2c2   : > { %v4245_v49 = vpop.eup %2510  ;;  %v1680_v44 = vmul.f32 %v4229_v12, %v4181_v61  ;;  %v1449_v42 = vsel %vm1448_vm6, %v2505_v39, %v1445_v13  ;;  %1899 = vst [vmem:[%s3221_s25 + $0x140] sm:$0xff] %v4234_v34  ;;  %v1739_v39 = vadd.f32 %v4169_v48, %v1738_v58  ;;  %v1747_v8 = vor.u32 1.1754944e-38, %v1746_v16 }
 0x2c3   : > { %4882 = vst [vmem:[#allocation17_spill] sm:$0xff] %v4252_v37  ;;  %v4256_v22 = vor.u32 1.1754944e-38, %v4883_v29  ;;  %v1456_v62 = vmul.f32 %v4245_v49, %v4188_v15  ;;  %v4260_v11 = vpop.xlane.xlu2 %1184  ;;  %v1454_v1 = vsel %vm1451_vm7, %v1453_v20, %v1449_v42  ;;  %vm1741_vm9 = vweird.f32 %v4169_v48 }
 0x2c4   : > { %v1681_v45 = vsub.f32 1.0, %v1680_v44  ;;  %2512 = vrcp.f32 %v4260_v11  ;;  %1900 = vst [vmem:[%s3221_s25 + $0x148] sm:$0xff] %v4237_v47  ;;  %v4270_v60 = vmul.f32 %v3421_v53, %v1454_v1  ;;  %v4273_v38 = vmul.f32 %v3440_v40, %v1454_v1  ;;  %vm4282_vm11 = vmor %vm1740_vm8, %vm1741_vm9 }
 0x2c5   : > { %v1457_v13 = vsub.f32 1.0, %v1456_v62  ;;  %1939 = vst [vmem:[%s3221_s25 + $0x280] sm:$0xf] %v4243_v17  ;;  %vm1684_vm10 = vweird.f32 %v4181_v61  ;;  %v1466_v58 = vand.u32 2147483648, %v4188_v15  ;;  %v1744_v53 = vand.u32 2147483647, %v4122_v57 }
 0x2c6   : > { %1940 = vst [vmem:[%s3221_s25 + $0x288] sm:$0xf] %v4252_v37  ;;  %v1725_v40 = vadd.f32 %v4115_v28, %v1724_v24  ;;  %vm1461_vm12 = vweird.f32 %v4245_v49  ;;  %v1743_v44 = vsel %vm4282_vm11, %v4169_v48, %v1739_v39  ;;  %vm1727_vm13 = vweird.f32 %v4115_v28 }
 0x2c7   : > { %v1458_v20 = vmul.f32 %v4245_v49, %v1457_v13  ;;  %1893 = vst [vmem:[%s3221_s25 + $0x110] sm:$0xff] %v4270_v60  ;;  %v1682_v42 = vmul.f32 %v4229_v12, %v1681_v45  ;;  %v1690_v0 = vand.u32 2147483648, %v4181_v61  ;;  %v1464_v57 = vand.u32 2147483647, %v4188_v15  ;;  %vm4307_vm1 = vmor %vm1726_vm5, %vm1727_vm13 }
 0x2c8   : > { %1894 = vst [vmem:[%s3221_s25 + $0x118] sm:$0xff] %v4273_v38  ;;  %vm1745_vm14 = vcmp.eq.f32.partialorder %v1744_v53, 8.507059e+37  ;;  %vm1460_vm15 = vweird.f32 %v4188_v15  ;;  %v1730_v1 = vand.u32 2147483647, %v4005_v23  ;;  %v1688_v45 = vand.u32 2147483647, %v4181_v61 }
 0x2c9   : > { %v4302_v24 = vpop.xlane.xlu0 %1166  ;;  %v1459_v29 = vadd.f32 %v4245_v49, %v1458_v20  ;;  %v1748_v62 = vsel %vm1745_vm14, %v1747_v8, %v1743_v44  ;;  %v1467_v13 = vor.u32 1.1754944e-38, %v1466_v58  ;;  %vm1462_vm2 = vmor %vm1460_vm15, %vm1461_vm12  ;;  %v1729_v15 = vsel %vm4307_vm1, %v4115_v28, %v1725_v40  ;;  %v4888_v53 = vld [vmem:[#allocation11_spill] sm:$0xff]  ;;  %v4889_v58 = vld [vmem:[#allocation13_spill] sm:$0xff] }
 0x2ca   : > { %v2513_v39 = vpop.eup %2512  ;;  %2514 = vrcp.f32 %v4302_v24  ;;  %v4324_v20 = vmul.f32 %v4888_v53, %v1748_v62  ;;  %v4327_v44 = vmul.f32 %v4889_v58, %v1748_v62  ;;  %v1683_v37 = vadd.f32 %v4229_v12, %v1682_v42 }
 0x2cb   : > { %v1694_v8 = vmul.f32 %v2513_v39, %v4260_v11  ;;  %v4320_v16 = vpop.xlane.xlu2 %1178  ;;  %v1463_v23 = vsel %vm1462_vm2, %v4245_v49, %v1459_v29  ;;  %vm1685_vm3 = vweird.f32 %v4229_v12  ;;  %vm1465_vm4 = vcmp.eq.f32.partialorder %v1464_v57, 8.507059e+37 }
 0x2cc   : > { %2516 = vrcp.f32 %v4320_v16  ;;  %v1691_v28 = vor.u32 1.1754944e-38, %v1690_v0  ;;  %v1468_v48 = vsel %vm1465_vm4, %v1467_v13, %v1463_v23  ;;  %1935 = vst [vmem:[%s3221_s25 + $0x260] sm:$0xff] %v4324_v20  ;;  %vm1731_vm5 = vcmp.eq.f32.partialorder %v1730_v1, 8.507059e+37  ;;  %vm4346_vm6 = vmor %vm1684_vm10, %vm1685_vm3  ;;  %v4892_v1 = vld [vmem:[#allocation6_spill] sm:$0xff] }
 0x2cd   : > { %v1695_v40 = vsub.f32 1.0, %v1694_v8  ;;  %v1704_v49 = vand.u32 2147483648, %v4260_v11  ;;  %v4336_v29 = vmul.f32 %v3324_v14, %v1468_v48  ;;  %v4339_v62 = vmul.f32 %v3330_v18, %v1468_v48  ;;  %1936 = vst [vmem:[%s3221_s25 + $0x268] sm:$0xff] %v4327_v44  ;;  %v4893_v14 = vld [vmem:[#allocation38_spill] sm:$0xff] }
 0x2ce   : > { %v1734_v42 = vsel %vm1731_vm5, %v4256_v22, %v1729_v15  ;;  %v1702_v18 = vand.u32 2147483647, %v4260_v11  ;;  %vm1689_vm7 = vcmp.eq.f32.partialorder %v1688_v45, 8.507059e+37  ;;  %vm1699_vm8 = vweird.f32 %v2513_v39 }
 0x2cf   : > { %v1696_v57 = vmul.f32 %v2513_v39, %v1695_v40  ;;  %v4351_v13 = vmul.f32 %v4892_v1, %v1734_v42  ;;  %v4354_v8 = vmul.f32 %v4893_v14, %v1734_v42  ;;  %1895 = vst [vmem:[%s3221_s25 + $0x120] sm:$0xff] %v4336_v29  ;;  %v1687_v61 = vsel %vm4346_vm6, %v4229_v12, %v1683_v37 }
 0x2d0   : > { %v2515_v23 = vpop.eup %2514  ;;  %vm1698_vm9 = vweird.f32 %v4260_v11  ;;  %1896 = vst [vmem:[%s3221_s25 + $0x128] sm:$0xff] %v4339_v62  ;;  %v1692_v58 = vsel %vm1689_vm7, %v1691_v28, %v1687_v61  ;;  %v1705_v45 = vor.u32 1.1754944e-38, %v1704_v49  ;;  %v1620_v48 = vand.u32 2147483648, %v4302_v24 }
 0x2d1   : > { %v1610_v22 = vmul.f32 %v2515_v23, %v4302_v24  ;;  %v4364_v15 = vpop.xlane.xlu0 %1085  ;;  %v1697_v53 = vadd.f32 %v2513_v39, %v1696_v57  ;;  %1933 = vst [vmem:[%s3221_s25 + $0x250] sm:$0xff] %v4351_v13  ;;  %vm1700_vm10 = vmor %vm1698_vm9, %vm1699_vm8  ;;  %vm1703_vm11 = vcmp.eq.f32.partialorder %v1702_v18, 8.507059e+37  ;;  %vm1615_vm12 = vweird.f32 %v2515_v23 }
 0x2d2   : > { %v2517_v40 = vpop.eup %2516  ;;  %2518 = vrcp.f32 %v4364_v15  ;;  %1934 = vst [vmem:[%s3221_s25 + $0x258] sm:$0xff] %v4354_v8  ;;  %v1618_v28 = vand.u32 2147483647, %v4302_v24  ;;  %v4377_v42 = vmul.f32 %v3427_v41, %v1692_v58  ;;  %vm1614_vm13 = vweird.f32 %v4302_v24 }
 0x2d3   : > { %v1611_v12 = vsub.f32 1.0, %v1610_v22  ;;  %v1666_v37 = vmul.f32 %v2517_v40, %v4320_v16  ;;  %v1701_v11 = vsel %vm1700_vm10, %v2513_v39, %v1697_v53  ;;  %v4388_v39 = vmul.f32 %v3498_v46, %v1692_v58  ;;  %vm1616_vm15 = vmor %vm1614_vm13, %vm1615_vm12 }
 0x2d4   : > { %v1706_v49 = vsel %vm1703_vm11, %v1705_v45, %v1701_v11  ;;  %1927 = vst [vmem:[%s3221_s25 + $0x220] sm:$0xff] %v4377_v42  ;;  %v1676_v41 = vand.u32 2147483648, %v4320_v16  ;;  %vm1671_vm14 = vweird.f32 %v2517_v40  ;;  %vm1619_vm1 = vcmp.eq.f32.partialorder %v1618_v28, 8.507059e+37 }
 0x2d5   : > { %v1612_v0 = vmul.f32 %v2515_v23, %v1611_v12  ;;  %v1667_v57 = vsub.f32 1.0, %v1666_v37  ;;  %v4380_v1 = vmul.f32 %v3510_v52, %v1706_v49  ;;  %v4383_v14 = vmul.f32 %v3518_v10, %v1706_v49  ;;  %1928 = vst [vmem:[%s3221_s25 + $0x228] sm:$0xff] %v4388_v39 }
 0x2d6   : > { %v1621_v52 = vor.u32 1.1754944e-38, %v1620_v48  ;;  %v1674_v10 = vand.u32 2147483647, %v4320_v16  ;;  %vm1670_vm2 = vweird.f32 %v4320_v16  ;;  %v1677_v48 = vor.u32 1.1754944e-38, %v1676_v41 }
 0x2d7   : > { %v1668_v18 = vmul.f32 %v2517_v40, %v1667_v57  ;;  %v1613_v61 = vadd.f32 %v2515_v23, %v1612_v0  ;;  %1929 = vst [vmem:[%s3221_s25 + $0x230] sm:$0xff] %v4380_v1  ;;  %vm1672_vm3 = vmor %vm1670_vm2, %vm1671_vm14  ;;  %v1240_v16 = vand.u32 2147483647, %v4364_v15  ;;  %vm1236_vm6 = vweird.f32 %v4364_v15 }
 0x2d8   : > { %v2519_v22 = vpop.eup %2518  ;;  %1930 = vst [vmem:[%s3221_s25 + $0x238] sm:$0xff] %v4383_v14  ;;  %vm1675_vm4 = vcmp.eq.f32.partialorder %v1674_v10, 8.507059e+37 }
 0x2d9   : > { %v1669_v46 = vadd.f32 %v2517_v40, %v1668_v18  ;;  %v1232_v53 = vmul.f32 %v2519_v22, %v4364_v15  ;;  %v1152_v24 = vpop.xlane.xlu0 %1151  ;;  %v1617_v58 = vsel %vm1616_vm15, %v2515_v23, %v1613_v61  ;;  %v1242_v23 = vand.u32 2147483648, %v4364_v15 }
 0x2da   : > { %2520 = vrcp.f32 %v1152_v24  ;;  %v1622_v45 = vsel %vm1619_vm1, %v1621_v52, %v1617_v58  ;;  %vm1237_vm5 = vweird.f32 %v2519_v22  ;;  %vm1241_vm8 = vcmp.eq.f32.partialorder %v1240_v16, 8.507059e+37 }
 0x2db   : > { %v1233_v12 = vsub.f32 1.0, %v1232_v53  ;;  %v4403_v37 = vmul.f32 %v3626_v9, %v1622_v45  ;;  %v4406_v11 = vmul.f32 %v3636_v32, %v1622_v45  ;;  %v1673_v28 = vsel %vm1672_vm3, %v2517_v40, %v1669_v46  ;;  %vm1238_vm7 = vmor %vm1236_vm6, %vm1237_vm5 }
 0x2dc   : > { %v1678_v0 = vsel %vm1675_vm4, %v1677_v48, %v1673_v28  ;;  %v1243_v18 = vor.u32 1.1754944e-38, %v1242_v23  ;;  %v1550_v46 = vand.u32 2147483648, %v1152_v24  ;;  %v1548_v58 = vand.u32 2147483647, %v1152_v24 }
 0x2dd   : > { %v1234_v49 = vmul.f32 %v2519_v22, %v1233_v12  ;;  %1917 = vst [vmem:[%s3221_s25 + $0x1d0] sm:$0xff] %v4403_v37  ;;  %v4415_v9 = vmul.f32 %v3549_v5, %v1678_v0  ;;  %v4418_v32 = vmul.f32 %v3556_v54, %v1678_v0  ;;  %vm1544_vm10 = vweird.f32 %v1152_v24 }
 0x2de   : > { %1918 = vst [vmem:[%s3221_s25 + $0x1d8] sm:$0xff] %v4406_v11  ;;  %v1551_v48 = vor.u32 1.1754944e-38, %v1550_v46  ;;  %vm1549_vm12 = vcmp.eq.f32.partialorder %v1548_v58, 8.507059e+37 }
 0x2df   : > { %v1235_v57 = vadd.f32 %v2519_v22, %v1234_v49  ;;  %1925 = vst [vmem:[%s3221_s25 + $0x210] sm:$0xff] %v4415_v9 }
 0x2e0   : > { %v2521_v40 = vpop.eup %2520  ;;  %1926 = vst [vmem:[%s3221_s25 + $0x218] sm:$0xff] %v4418_v32 }
 0x2e1   : > { %v1540_v41 = vmul.f32 %v2521_v40, %v1152_v24  ;;  %v1146_v61 = vpop.xlane.xlu0 %1145  ;;  %v1239_v52 = vsel %vm1238_vm7, %v2519_v22, %v1235_v57  ;;  %vm1545_vm9 = vweird.f32 %v2521_v40  ;;  %v2535_v57 = vld [vmem:[%s3221_s25 + $0x1f8] sm:$0xff] }
 0x2e2   : > { %2522 = vrcp.f32 %v1146_v61  ;;  %v1244_v5 = vsel %vm1241_vm8, %v1243_v18, %v1239_v52  ;;  %vm1546_vm11 = vmor %vm1544_vm10, %vm1545_vm9  ;;  %v1522_v16 = vand.u32 2147483648, %v1146_v61  ;;  %vm1516_vm14 = vweird.f32 %v1146_v61  ;;  %v2537_v52 = vld [vmem:[%s3221_s25 + $0x1e8] sm:$0xff] }
 0x2e3   : > { %v1541_v54 = vsub.f32 1.0, %v1540_v41  ;;  %v1781_v10 = vmul.f32 %v3180_v36, %v1244_v5  ;;  %v1782_v15 = vmul.f32 %v3312_v26, %v1244_v5  ;;  %v2536_v41 = vld [vmem:[%s3221_s25 + $0x1e0] sm:$0xff] }
 0x2e5   : > { %v1542_v53 = vmul.f32 %v2521_v40, %v1541_v54  ;;  %1863 = vst [vmem:[%s3221_s25 + $0x20] sm:$0xff] %v1781_v10  ;;  %1959 = vmatpush.xpose.msrb.mxu2 %v1781_v10  ;;  %1979 = vmatpush.xpose.msrb.mxu3 %v1782_v15 }
 0x2e6   : > { %1864 = vst [vmem:[%s3221_s25 + $0x28] sm:$0xff] %v1782_v15 }
 0x2e7   : > { %v1543_v22 = vadd.f32 %v2521_v40, %v1542_v53 }
 0x2e8   : > { %v2523_v45 = vpop.eup %2522 }
 0x2e9   : > { %v1512_v12 = vmul.f32 %v2523_v45, %v1146_v61  ;;  %1960 = vmatpush.xpose.msrb.mxu2 %v4061_v30  ;;  %1980 = vmatpush.xpose.msrb.mxu3 %v4064_v3  ;;  %v1197_v36 = vpop.xlane.xlu0 %1196  ;;  %v1547_v26 = vsel %vm1546_vm11, %v2521_v40, %v1543_v22  ;;  %vm1517_vm13 = vweird.f32 %v2523_v45  ;;  %v1520_v3 = vand.u32 2147483647, %v1146_v61  ;;  %v2534_v30 = vld [vmem:[%s3221_s25 + $0x1f0] sm:$0xff] }
 0x2ea   : > { %2524 = vrcp.f32 %v1197_v36  ;;  %v1552_v23 = vsel %vm1549_vm12, %v1551_v48, %v1547_v26  ;;  %v1523_v40 = vor.u32 1.1754944e-38, %v1522_v16  ;;  %vm1518_vm15 = vmor %vm1516_vm14, %vm1517_vm13  ;;  %v1760_v15 = vand.u32 2147483648, %v1197_v36 }
 0x2eb   : > { %v1513_v28 = vsub.f32 1.0, %v1512_v12  ;;  %v4432_v24 = vmul.f32 %v3564_v27, %v1552_v23  ;;  %v4435_v49 = vmul.f32 %v3577_v43, %v1552_v23  ;;  %vm1521_vm1 = vcmp.eq.f32.partialorder %v1520_v3, 8.507059e+37 }
 0x2ec   : > { %v1758_v53 = vand.u32 2147483647, %v1197_v36  ;;  %vm1754_vm3 = vweird.f32 %v1197_v36 }
 0x2ed   : > { %v1514_v0 = vmul.f32 %v2523_v45, %v1513_v28  ;;  %1961 = vmatpush.xpose.msrb.mxu2 %v3989_v7  ;;  %1981 = vmatpush.xpose.msrb.mxu3 %v3998_v19  ;;  %1907 = vst [vmem:[%s3221_s25 + $0x180] sm:$0xff] %v4432_v24 }
 0x2ee   : > { %1908 = vst [vmem:[%s3221_s25 + $0x188] sm:$0xff] %v4435_v49  ;;  %vm1759_vm5 = vcmp.eq.f32.partialorder %v1758_v53, 8.507059e+37 }
 0x2ef   : > { %v1515_v27 = vadd.f32 %v2523_v45, %v1514_v0 }
 0x2f0   : > { %v2525_v43 = vpop.eup %2524 }
 0x2f1   : > { %1986 = vmatpush.xpose.msra.mxu2 %v2534_v30  ;;  %2006 = vmatpush.xpose.msra.mxu3 %v2535_v57  ;;  %v1750_v7 = vmul.f32 %v2525_v43, %v1197_v36  ;;  %v1137_v19 = vpop.xlane.xlu0 %1136  ;;  %v1519_v18 = vsel %vm1518_vm15, %v2523_v45, %v1515_v27  ;;  %vm1755_vm2 = vweird.f32 %v2525_v43  ;;  %v4484_v27 = vld.sshfl [vmem:[#allocation1 + $0x8] sm:$0xff pattern:$0x75316420] }
 0x2f2   : > { %2526 = vrcp.f32 %v1137_v19  ;;  %v1524_v5 = vsel %vm1521_vm1, %v1523_v40, %v1519_v18  ;;  %vm1756_vm4 = vmor %vm1754_vm3, %vm1755_vm2  ;;  %v1480_v26 = vand.u32 2147483648, %v1137_v19  ;;  %v1478_v28 = vand.u32 2147483647, %v1137_v19  ;;  %1982 = vmatmul.f32.vlgmr.msrb.gmra.mxu3 %v4484_v27  ;;  %v4895_v40 = vld [vmem:[#allocation45_spill] sm:$0xff] }
 0x2f3   : > { %v1751_v54 = vsub.f32 1.0, %v1750_v7  ;;  %v4448_v10 = vmul.f32 %v3803_v50, %v1524_v5  ;;  %v4451_v61 = vmul.f32 %v3806_v33, %v1524_v5  ;;  %v1761_v50 = vor.u32 1.1754944e-38, %v1760_v15 }
 0x2f4   : > { %vm1474_vm7 = vweird.f32 %v1137_v19  ;;  %vm1479_vm9 = vcmp.eq.f32.partialorder %v1478_v28, 8.507059e+37 }
 0x2f5   : > { %1987 = vmatpush.xpose.msra.mxu2 %v2536_v41  ;;  %2007 = vmatpush.xpose.msra.mxu3 %v2537_v52  ;;  %v1752_v46 = vmul.f32 %v2525_v43, %v1751_v54  ;;  %1903 = vst [vmem:[%s3221_s25 + $0x160] sm:$0xff] %v4448_v10 }
 0x2f6   : > { %1904 = vst [vmem:[%s3221_s25 + $0x168] sm:$0xff] %v4451_v61 }
 0x2f7   : > { %v1753_v58 = vadd.f32 %v2525_v43, %v1752_v46  ;;  %v4896_v46 = vld [vmem:[#allocation35_spill] sm:$0xff] }
 0x2f8   : > { %v2527_v22 = vpop.eup %2526 }
 0x2f9   : > { %1988 = vmatpush.xpose.msra.mxu2 %v4403_v37  ;;  %2008 = vmatpush.xpose.msra.mxu3 %v4406_v11  ;;  %v1470_v33 = vmul.f32 %v2527_v22, %v1137_v19  ;;  %v1188_v45 = vpop.xlane.xlu0 %1187  ;;  %v1757_v48 = vsel %vm1756_vm4, %v2525_v43, %v1753_v58  ;;  %vm1475_vm6 = vweird.f32 %v2527_v22  ;;  %v4897_v58 = vld [vmem:[#allocation36_spill] sm:$0xff] }
 0x2fa   : > { %2528 = vrcp.f32 %v1188_v45  ;;  %v1762_v37 = vsel %vm1759_vm5, %v1761_v50, %v1757_v48  ;;  %vm1476_vm8 = vmor %vm1474_vm7, %vm1475_vm6  ;;  %v1718_v43 = vand.u32 2147483648, %v1188_v45  ;;  %vm1712_vm11 = vweird.f32 %v1188_v45  ;;  %v4899_v48 = vld [vmem:[#allocation16_spill] sm:$0xff] }
 0x2fb   : > { %v1471_v11 = vsub.f32 1.0, %v1470_v33  ;;  %v4462_v12 = vmul.f32 %v3821_v51, %v1762_v37  ;;  %v4465_v36 = vmul.f32 %v3823_v35, %v1762_v37  ;;  %v1481_v51 = vor.u32 1.1754944e-38, %v1480_v26 }
 0x2fc   : > { %v1719_v19 = vor.u32 1.1754944e-38, %v1718_v43  ;;  %v4902_v43 = vld [vmem:[#allocation31_spill] sm:$0xff]  ;;  %vm2072_vm7 = vcmask 551936  }
 0x2fd   : > { %1989 = vmatpush.xpose.msra.mxu2 %v4145_v55  ;;  %2009 = vmatpush.xpose.msra.mxu3 %v4148_v59  ;;  %v1472_v23 = vmul.f32 %v2527_v22, %v1471_v11  ;;  %1937 = vst [vmem:[%s3221_s25 + $0x270] sm:$0xff] %v4462_v12 }
 0x2fe   : > { %1938 = vst [vmem:[%s3221_s25 + $0x278] sm:$0xff] %v4465_v36 }
 0x2ff   : > { %v1473_v55 = vadd.f32 %v2527_v22, %v1472_v23 }
 0x300   : > { %v2529_v59 = vpop.eup %2528 }
 0x301   : > { %1990 = vmatpush.xpose.msra.mxu2 %v4094_v6  ;;  %2010 = vmatpush.xpose.msra.mxu3 %v4097_v63  ;;  %v1708_v16 = vmul.f32 %v2529_v59, %v1188_v45  ;;  %v1128_v35 = vpop.xlane.xlu0 %1127  ;;  %v1477_v0 = vsel %vm1476_vm8, %v2527_v22, %v1473_v55  ;;  %v4475_v63 = vld.sshfl [vmem:[#allocation1] sm:$0xff pattern:$0x75316420]  ;;  %vm1713_vm10 = vweird.f32 %v2529_v59  ;;  %v4900_v55 = vld [vmem:[#allocation43_spill] sm:$0xff] }
 0x302   : > { %2530 = vrcp.f32 %v1128_v35  ;;  %v1482_v6 = vsel %vm1479_vm9, %v1481_v51, %v1477_v0  ;;  %1962 = vmatmul.f32.vlgmr.msrb.gmra.mxu2 %v4475_v63  ;;  %vm1714_vm12 = vmor %vm1712_vm11, %vm1713_vm10  ;;  %v1438_v15 = vand.u32 2147483648, %v1128_v35  ;;  %v1436_v33 = vand.u32 2147483647, %v1128_v35  ;;  %v4901_v51 = vld [vmem:[#allocation30_spill] sm:$0xff] }
 0x303   : > { %v1709_v3 = vsub.f32 1.0, %v1708_v16  ;;  %v4478_v30 = vmul.f32 %v3835_v21, %v1482_v6  ;;  %v4481_v57 = vmul.f32 %v3837_v56, %v1482_v6  ;;  %v1716_v21 = vand.u32 2147483647, %v1188_v45  ;;  %v4898_v45 = vld [vmem:[#allocation56_spill] sm:$0xff] }
 0x304   : > { %vm1432_vm15 = vweird.f32 %v1128_v35  ;;  %v1439_v37 = vor.u32 1.1754944e-38, %v1438_v15  ;;  %vm1437_vm2 = vcmp.eq.f32.partialorder %v1436_v33, 8.507059e+37 }
 0x305   : > { %1991 = vmatpush.xpose.msra.mxu2 %v4082_v2  ;;  %2011 = vmatpush.xpose.msra.mxu3 %v4100_v4  ;;  %v1710_v2 = vmul.f32 %v2529_v59, %v1709_v3  ;;  %1897 = vst [vmem:[%s3221_s25 + $0x130] sm:$0xff] %v4478_v30  ;;  %v4894_v4 = vld [vmem:[#allocation47_spill] sm:$0xff]  ;;  %vm1717_vm13 = vcmp.eq.f32.partialorder %v1716_v21, 8.507059e+37 }
 0x306   : > { %1898 = vst [vmem:[%s3221_s25 + $0x138] sm:$0xff] %v4481_v57 }
 0x307   : > { %v1711_v56 = vadd.f32 %v2529_v59, %v1710_v2 }
 0x308   : > { %v2531_v7 = vpop.eup %2530 }
 0x309   : > { %1992 = vmatpush.xpose.msra.mxu2 %v4894_v4  ;;  %2012 = vmatpush.xpose.msra.mxu3 %v4895_v40  ;;  %v1428_v18 = vmul.f32 %v2531_v7, %v1128_v35  ;;  %v1176_v41 = vpop.xlane.xlu0 %1175  ;;  %v1715_v52 = vsel %vm1714_vm12, %v2529_v59, %v1711_v56  ;;  %vm1433_vm14 = vweird.f32 %v2531_v7  ;;  %v4903_v40 = vld [vmem:[#allocation46_spill] sm:$0xff] }
 0x30a   : > { %2532 = vrcp.f32 %v1176_v41  ;;  %v1720_v54 = vsel %vm1717_vm13, %v1719_v19, %v1715_v52  ;;  %vm1434_vm1 = vmor %vm1432_vm15, %vm1433_vm14  ;;  %v1662_v35 = vand.u32 2147483648, %v1176_v41  ;;  %v1660_v6 = vand.u32 2147483647, %v1176_v41 }
 0x30b   : > { %v1429_v5 = vsub.f32 1.0, %v1428_v18  ;;  %v1849_v53 = vmul.f32 %v4896_v46, %v1720_v54  ;;  %v1850_v22 = vmul.f32 %v4897_v58, %v1720_v54  ;;  %vm1656_vm4 = vweird.f32 %v1176_v41 }
 0x30c   : > { %vm1661_vm6 = vcmp.eq.f32.partialorder %v1660_v6, 8.507059e+37 }
 0x30d   : > { %1993 = vmatpush.xpose.msra.mxu2 %v4432_v24  ;;  %2013 = vmatpush.xpose.msra.mxu3 %v4435_v49  ;;  %v1430_v50 = vmul.f32 %v2531_v7, %v1429_v5  ;;  %1931 = vst [vmem:[%s3221_s25 + $0x240] sm:$0xff] %v1849_v53 }
 0x30e   : > { %1932 = vst [vmem:[%s3221_s25 + $0x248] sm:$0xff] %v1850_v22 }
 0x30f   : > { %v1431_v24 = vadd.f32 %v2531_v7, %v1430_v50 }
 0x310   : > { %v2533_v49 = vpop.eup %2532 }
 0x311   : > { %1994 = vmatpush.xpose.msra.mxu2 %v4898_v45  ;;  %2014 = vmatpush.xpose.msra.mxu3 %v4899_v48  ;;  %v1652_v11 = vmul.f32 %v2533_v49, %v1176_v41  ;;  %v1435_v26 = vsel %vm1434_vm1, %v2531_v7, %v1431_v24  ;;  %vm1657_vm3 = vweird.f32 %v2533_v49 }
 0x312   : > { %v1440_v23 = vsel %vm1437_vm2, %v1439_v37, %v1435_v26  ;;  %vm1658_vm5 = vmor %vm1656_vm4, %vm1657_vm3 }
 0x313   : > { %v1653_v28 = vsub.f32 1.0, %v1652_v11  ;;  %v1809_v59 = vmul.f32 %v4900_v55, %v1440_v23  ;;  %v1810_v16 = vmul.f32 %v4901_v51, %v1440_v23 }
 0x315   : > { %1995 = vmatpush.xpose.msra.mxu2 %v4448_v10  ;;  %2015 = vmatpush.xpose.msra.mxu3 %v4451_v61  ;;  %v1654_v0 = vmul.f32 %v2533_v49, %v1653_v28  ;;  %1891 = vst [vmem:[%s3221_s25 + $0x100] sm:$0xff] %v1809_v59  ;;  %v1663_v61 = vor.u32 1.1754944e-38, %v1662_v35 }
 0x316   : > { %1892 = vst [vmem:[%s3221_s25 + $0x108] sm:$0xff] %v1810_v16 }
 0x317   : > { %v1655_v10 = vadd.f32 %v2533_v49, %v1654_v0 }
 0x319   : > { %1996 = vmatpush.xpose.msra.mxu2 %v4220_v31  ;;  %2016 = vmatpush.xpose.msra.mxu3 %v4223_v25  ;;  %v1659_v3 = vsel %vm1658_vm5, %v2533_v49, %v1655_v10  ;;  %v4904_v31 = vld [vmem:[#allocation17_spill] sm:$0xff] }
 0x31a   : > { %v1664_v2 = vsel %vm1661_vm6, %v1663_v61, %v1659_v3 }
 0x31b   : > { %v1841_v4 = vmul.f32 %v4902_v43, %v1664_v2  ;;  %v1842_v21 = vmul.f32 %v4903_v40, %v1664_v2 }
 0x31d   : > { %1997 = vmatpush.xpose.msra.mxu2 %v4234_v34  ;;  %2017 = vmatpush.xpose.msra.mxu3 %v4237_v47  ;;  %1923 = vst [vmem:[%s3221_s25 + $0x200] sm:$0xff] %v1841_v4 }
 0x31e   : > { %1924 = vst [vmem:[%s3221_s25 + $0x208] sm:$0xff] %v1842_v21 }
 0x321   : > { %1998 = vmatpush.xpose.msra.mxu2 %v4478_v30  ;;  %2018 = vmatpush.xpose.msra.mxu3 %v4481_v57 }
 0x325   : > { %1999 = vmatpush.xpose.msra.mxu2 %v4336_v29  ;;  %2019 = vmatpush.xpose.msra.mxu3 %v4339_v62 }
 0x329   : > { %2000 = vmatpush.xpose.msra.mxu2 %v4270_v60  ;;  %2020 = vmatpush.xpose.msra.mxu3 %v4273_v38 }
 0x32d   : > { %2001 = vmatpush.xpose.msra.mxu2 %v1809_v59  ;;  %2021 = vmatpush.xpose.msra.mxu3 %v1810_v16 }
 0x330   : > { %2002 = vmatmul.f32.vlgmr.msra.gmra.mxu2 %v4475_v63  ;;  %2022 = vmatmul.f32.vlgmr.msra.gmra.mxu3 %v4484_v27 }
 0x331   : > { %2033 = vmatpush.xpose.msrb.mxu2 %v4243_v17  ;;  %2053 = vmatpush.xpose.msrb.mxu3 %v4904_v31 }
 0x335   : > { %2034 = vmatpush.xpose.msrb.mxu2 %v4462_v12  ;;  %2054 = vmatpush.xpose.msrb.mxu3 %v4465_v36 }
 0x339   : > { %2035 = vmatpush.xpose.msrb.mxu2 %v4324_v20  ;;  %2055 = vmatpush.xpose.msrb.mxu3 %v4327_v44 }
 0x33d   : > { %2036 = vmatpush.xpose.msrb.mxu2 %v4351_v13  ;;  %2056 = vmatpush.xpose.msrb.mxu3 %v4354_v8 }
 0x341   : > { %2037 = vmatpush.xpose.msrb.mxu2 %v1849_v53  ;;  %2057 = vmatpush.xpose.msrb.mxu3 %v1850_v22 }
 0x345   : > { %2038 = vmatpush.xpose.msrb.mxu2 %v4380_v1  ;;  %2058 = vmatpush.xpose.msrb.mxu3 %v4383_v14 }
 0x349   : > { %2039 = vmatpush.xpose.msrb.mxu2 %v4377_v42  ;;  %2059 = vmatpush.xpose.msrb.mxu3 %v4388_v39 }
 0x34d   : > { %2040 = vmatpush.xpose.msrb.mxu2 %v4415_v9  ;;  %2060 = vmatpush.xpose.msrb.mxu3 %v4418_v32 }
 0x351   : > { %2041 = vmatpush.xpose.msrb.mxu2 %v1841_v4  ;;  %2061 = vmatpush.xpose.msrb.mxu3 %v1842_v21 }
 0x354   : > { %2042 = vmatmul.f32.vlgmr.msrb.gmra.mxu2 %v4475_v63  ;;  %2062 = vmatmul.f32.vlgmr.msrb.gmra.mxu3 %v4484_v27 }
 0x375   : > { %v1983_v34 = vpop.f32.mrf.mxu3 }
 0x385   : > { %v1963_v25 = vpop.f32.mrf.mxu2 }
 0x386   : > { %v1984_v38 = vadd.f32 %v1983_v34, %v1963_v25 }
 0x3b3   : > { %v2003_v47 = vpop.f32.mrf.mxu2  ;;  %v2023_v17 = vpop.f32.mrf.mxu3 }
 0x3b4   : > { %v2024_v60 = vadd.f32 %v2023_v17, %v2003_v47 }
 0x3b6   : > { %v2068_v20 = vrot.slane %v2024_v60, 4 }
 0x3b8   : > { %v2069_v44 = vsel %vm213_vm0, %v1984_v38, %v2068_v20 }
 0x3b9   : > { %2071 = vst [vmem:[%s198_s29] sm:$0xff] %v2069_v44 }
 0x3d7   : > { %v2043_v29 = vpop.f32.mrf.mxu2  ;;  %v2063_v62 = vpop.f32.mrf.mxu3 }
 0x3d8   : > { %v2064_v13 = vadd.f32 %v2063_v62, %v2043_v29 }
 0x3da   : > { %2073 = vst.msk [vmem:[%s198_s29 + $0x8] sm:$0xf] %vm2072_vm7, %v2064_v13 }
 0x3db PF: > { %s14_s12 = sadd.s32 1, %s2544_s12  }
 0x3dc   : > { %p11_p4 = scmp.ge.s32.totalorder %s14_s12, 4  }
 0x3de   :  { %13 = sbr.rel (!%p11_p4) target bundleno = 1 (0x1), region = 73 }

</bundles_post_ra>
